<compile_context>
chip_gen: v7x
topology: tpu7x:2x2x1
jax: 0.10.0
libtpu: 0.0.40
codegen_flags: <defaults>
</compile_context>

<pallas_src>
import functools
import math

import jax
import jax.numpy as jnp
from jax.experimental import pallas as pl
from jax.experimental.pallas import tpu as pltpu

_SQRT_HALF = 0.7071067811865476


def _erf(x):
    # Abramowitz & Stegun 7.1.26 rational approximation, |err| <= 1.5e-7,
    # built only from ops with guaranteed Mosaic lowerings (exact divide kept
    # for accuracy; it lowers through the EUP reciprocal path anyway).
    a = jnp.abs(x)
    t = 1.0 / (1.0 + 0.3275911 * a)
    poly = t * (0.254829592 + t * (-0.284496736 + t * (1.421413741
               + t * (-1.453152027 + t * 1.061405429))))
    y = 1.0 - poly * jnp.exp(-a * a)
    return jnp.where(x < 0, -y, y)


def _gelu_exact(x):
    # PyTorch nn.GELU() default is the exact (erf-based) GELU.
    return 0.5 * x * (1.0 + _erf(x * _SQRT_HALF))


def _convnext_block_kernel(x_pad_ref, wc_ref, bc_ref, w1_ref, b1_ref,
                           w2_ref, b2_ref, gamma_ref, out_ref,
                           *, tile_h, width):
    # x_pad_ref: (H+2, W+2, C) padded image for this batch element (VMEM-resident)
    # out_ref:   (tile_h, W, C) output row-tile
    c = out_ref.shape[-1]
    t = pl.program_id(1)
    row0 = pl.multiple_of(t * tile_h, tile_h)   # top padded row of this tile

    # --- 3x3 full conv as 9 shifted matmuls, accumulated in f32 ------------
    acc = jnp.zeros((tile_h * width, c), jnp.float32)
    for ky in range(3):
        rows = x_pad_ref[pl.ds(row0 + ky, tile_h)]          # (tile_h, W+2, C)
        for kx in range(3):
            win = rows[:, kx:kx + width, :].reshape(tile_h * width, c)
            acc = acc + jnp.dot(win, wc_ref[ky * 3 + kx],
                                preferred_element_type=jnp.float32)
    conv = acc + bc_ref[0].astype(jnp.float32)

    # --- pwconv1 -> exact GELU -> pwconv2 (MXU in param dtype, f32 accum) --
    y = jnp.dot(conv.astype(w1_ref.dtype), w1_ref[...],
                preferred_element_type=jnp.float32) + b1_ref[0].astype(jnp.float32)
    y = _gelu_exact(y)
    y = jnp.dot(y.astype(w2_ref.dtype), w2_ref[...],
                preferred_element_type=jnp.float32) + b2_ref[0].astype(jnp.float32)

    # layer-scale gamma (drop_path == Identity)
    y = y * gamma_ref[0].astype(jnp.float32)

    # --- residual add: residual = center of the padded input (no extra DMA) -
    res = x_pad_ref[pl.ds(row0 + 1, tile_h)][:, 1:1 + width, :]
    out = res.astype(jnp.float32) + y.reshape(tile_h, width, c)
    out_ref[...] = out.astype(out_ref.dtype)


def _pick_tile_h(H, W, target_rows=1024):
    """Largest divisor of H with tile_h * W <= target_rows (>= 1)."""
    best = 1
    for th in range(1, H + 1):
        if H % th == 0 and th * W <= target_rows:
            best = th
    return best


def convnext_block(x_nchw, params, *, tile_h=None):
    B, C, H, W = x_nchw.shape
    if tile_h is None:
        tile_h = _pick_tile_h(H, W)
    assert H % tile_h == 0, "tile_h must divide H"
    n_tiles = H // tile_h

    x_nhwc = jnp.transpose(x_nchw, (0, 2, 3, 1))                 # (B, H, W, C)
    x_pad = jnp.pad(x_nhwc, ((0, 0), (1, 1), (1, 1), (0, 0)))    # (B, H+2, W+2, C)

    # conv weight (C_out, C_in, 3, 3) -> (3, 3, C_in, C_out) -> (9, C_in, C_out)
    wc = jnp.transpose(params["conv_w"], (2, 3, 1, 0)).reshape(9, C, C)
    bc = params["conv_b"].reshape(1, C)
    w1 = params["w1"].T                       # torch Linear: y = x @ W.T + b
    b1 = params["b1"].reshape(1, C)
    w2 = params["w2"].T
    b2 = params["b2"].reshape(1, C)
    gamma = params["gamma"].reshape(1, C)

    kernel = functools.partial(_convnext_block_kernel, tile_h=tile_h, width=W)

    out_nhwc = pl.pallas_call(
        kernel,
        out_shape=jax.ShapeDtypeStruct((B, H, W, C), x_nchw.dtype),
        grid_spec=pltpu.PrefetchScalarGridSpec(
            num_scalar_prefetch=0,
            grid=(B, n_tiles),
            in_specs=[
                # padded image: constant block index across t -> DMA'd once per
                # batch element and held resident in VMEM while row tiles run.
                pl.BlockSpec((None, H + 2, W + 2, C), lambda b, t: (b, 0, 0, 0)),
                pl.BlockSpec((9, C, C), lambda b, t: (0, 0, 0)),   # conv taps
                pl.BlockSpec((1, C), lambda b, t: (0, 0)),         # conv bias
                pl.BlockSpec((C, C), lambda b, t: (0, 0)),         # w1^T
                pl.BlockSpec((1, C), lambda b, t: (0, 0)),         # b1
                pl.BlockSpec((C, C), lambda b, t: (0, 0)),         # w2^T
                pl.BlockSpec((1, C), lambda b, t: (0, 0)),         # b2
                pl.BlockSpec((1, C), lambda b, t: (0, 0)),         # gamma
            ],
            out_specs=pl.BlockSpec((None, tile_h, W, C), lambda b, t: (b, t, 0, 0)),
        ),
        compiler_params=pltpu.CompilerParams(
            dimension_semantics=("parallel", "parallel"),
            vmem_limit_bytes=48 * 1024 * 1024,
        ),
    )(x_pad, wc, bc, w1, b1, w2, b2, gamma)

    return jnp.transpose(out_nhwc, (0, 3, 1, 2))


def init_params(key, dim, layer_scale_init_value=1e-6, dtype=jnp.float32):
    """Deterministic synthetic parameters with PyTorch-default-like fan-in bounds."""
    ks = jax.random.split(key, 6)
    conv_bound = 1.0 / math.sqrt(dim * 3 * 3)
    lin_bound = 1.0 / math.sqrt(dim)
    return dict(
        conv_w=jax.random.uniform(ks[0], (dim, dim, 3, 3), dtype, -conv_bound, conv_bound),
        conv_b=jax.random.uniform(ks[1], (dim,), dtype, -conv_bound, conv_bound),
        w1=jax.random.uniform(ks[2], (dim, dim), dtype, -lin_bound, lin_bound),
        b1=jax.random.uniform(ks[3], (dim,), dtype, -lin_bound, lin_bound),
        w2=jax.random.uniform(ks[4], (dim, dim), dtype, -lin_bound, lin_bound),
        b2=jax.random.uniform(ks[5], (dim,), dtype, -lin_bound, lin_bound),
        gamma=layer_scale_init_value * jnp.ones((dim,), dtype),
    )


def _reference(x, params):
    # Pure-JAX reference matching the PyTorch forward exactly
    # (note: this module's "dwconv" is a FULL 3x3 conv, groups=1, per the spec).
    out = jax.lax.conv_general_dilated(
        x, params["conv_w"], window_strides=(1, 1), padding=((1, 1), (1, 1)),
        dimension_numbers=("NCHW", "OIHW", "NCHW"))
    out = out + params["conv_b"][None, :, None, None]
    out = jnp.transpose(out, (0, 2, 3, 1))
    out = out @ params["w1"].T + params["b1"]
    out = jax.nn.gelu(out, approximate=False)
    out = out @ params["w2"].T + params["b2"]
    out = params["gamma"] * out
    out = jnp.transpose(out, (0, 3, 1, 2))
    return x + out


if __name__ == "__main__":
    key = jax.random.PRNGKey(0)
    k_x, k_p = jax.random.split(key)
    B, C, H, W = 2, 4, 16, 16          # dim = 4
    x = jax.random.normal(k_x, (B, C, H, W), jnp.float32)

    for ls in (1e-6, 1.0):             # spec default and a branch-visible scale
        params = init_params(k_p, C, layer_scale_init_value=ls)
        ref = _reference(x, params)
        for th in (8, None):           # multi-tile halo path and single-tile path
            out = convnext_block(x, params, tile_h=th)
            jax.block_until_ready(out)
            assert out.shape == x.shape and out.dtype == x.dtype
            assert jnp.allclose(out, ref, atol=1e-4, rtol=1e-4), \
                f"mismatch vs JAX reference (layer_scale={ls}, tile_h={th})"
    print("KERNEL_OK")
</pallas_src>

<mosaic_0001>
module attributes {stable_mosaic.version = 11 : i64} {
  func.func @_convnext_block_kernel(%arg0: i32, %arg1: i32, %arg2: memref<1x18x18x4xf32, #tpu.memory_space<vmem>>, %arg3: memref<9x4x4xf32, #tpu.memory_space<vmem>>, %arg4: memref<1x4xf32, #tpu.memory_space<vmem>>, %arg5: memref<4x4xf32, #tpu.memory_space<vmem>>, %arg6: memref<1x4xf32, #tpu.memory_space<vmem>>, %arg7: memref<4x4xf32, #tpu.memory_space<vmem>>, %arg8: memref<1x4xf32, #tpu.memory_space<vmem>>, %arg9: memref<1x4xf32, #tpu.memory_space<vmem>>, %arg10: memref<1x8x16x4xf32, #tpu.memory_space<vmem>>) attributes {dimension_semantics = [#tpu.dimension_semantics<parallel>, #tpu.dimension_semantics<parallel>], iteration_bounds = array<i64: 2, 2>, scalar_prefetch = 0 : i64, scratch_operands = 0 : i64, tpu.core_type = #tpu.core_type<tc>, window_params = [{transform_indices = @transform_0, window_bounds = array<i64: 1, 18, 18, 4>}, {pipeline_mode = #tpu.pipeline_mode<synchronous>, transform_indices = @transform_1, window_bounds = array<i64: 9, 4, 4>}, {pipeline_mode = #tpu.pipeline_mode<synchronous>, transform_indices = @transform_2, window_bounds = array<i64: 1, 4>}, {pipeline_mode = #tpu.pipeline_mode<synchronous>, transform_indices = @transform_3, window_bounds = array<i64: 4, 4>}, {pipeline_mode = #tpu.pipeline_mode<synchronous>, transform_indices = @transform_4, window_bounds = array<i64: 1, 4>}, {pipeline_mode = #tpu.pipeline_mode<synchronous>, transform_indices = @transform_5, window_bounds = array<i64: 4, 4>}, {pipeline_mode = #tpu.pipeline_mode<synchronous>, transform_indices = @transform_6, window_bounds = array<i64: 1, 4>}, {pipeline_mode = #tpu.pipeline_mode<synchronous>, transform_indices = @transform_7, window_bounds = array<i64: 1, 4>}, {transform_indices = @transform_8, window_bounds = array<i64: 1, 8, 16, 4>}]} {
    %c8_i32 = arith.constant 8 : i32
    %0 = arith.muli %arg1, %c8_i32 : i32
    %1 = tpu.assume_multiple %0, 8 : i32
    %cst = arith.constant 0.000000e+00 : f32
    %2 = vector.broadcast %cst : f32 to vector<128x4xf32>
    %c0_i32 = arith.constant 0 : i32
    %3 = arith.addi %1, %c0_i32 : i32
    %c0 = arith.constant 0 : index
    %4 = arith.index_cast %3 : i32 to index
    %c0_0 = arith.constant 0 : index
    %c0_1 = arith.constant 0 : index
    %5 = vector.load %arg2[%c0, %4, %c0_0, %c0_1] : memref<1x18x18x4xf32, #tpu.memory_space<vmem>>, vector<1x8x18x4xf32>
    %6 = vector.shape_cast %5 : vector<1x8x18x4xf32> to vector<8x18x4xf32>
    %7 = vector.extract_strided_slice %6 {offsets = [0, 0, 0], sizes = [8, 16, 4], strides = [1, 1, 1]} : vector<8x18x4xf32> to vector<8x16x4xf32>
    %8 = vector.shape_cast %7 : vector<8x16x4xf32> to vector<128x4xf32>
    %c0_2 = arith.constant 0 : index
    %c0_3 = arith.constant 0 : index
    %c0_4 = arith.constant 0 : index
    %9 = vector.load %arg3[%c0_2, %c0_3, %c0_4] : memref<9x4x4xf32, #tpu.memory_space<vmem>>, vector<1x4x4xf32>
    %10 = vector.shape_cast %9 : vector<1x4x4xf32> to vector<4x4xf32>
    %cst_5 = arith.constant dense<0.000000e+00> : vector<128x4xf32>
    %11 = tpu.matmul %8, %10, %cst_5 {dimension_numbers = #tpu.dot_dimension_numbers<[1], [0], [0], [1], [0, 0, 1, 1], [], []>} : vector<128x4xf32>, vector<4x4xf32>, vector<128x4xf32> -> vector<128x4xf32>
    %12 = arith.addf %2, %11 : vector<128x4xf32>
    %13 = vector.extract_strided_slice %6 {offsets = [0, 1, 0], sizes = [8, 16, 4], strides = [1, 1, 1]} : vector<8x18x4xf32> to vector<8x16x4xf32>
    %14 = vector.shape_cast %13 : vector<8x16x4xf32> to vector<128x4xf32>
    %c1 = arith.constant 1 : index
    %c0_6 = arith.constant 0 : index
    %c0_7 = arith.constant 0 : index
    %15 = vector.load %arg3[%c1, %c0_6, %c0_7] : memref<9x4x4xf32, #tpu.memory_space<vmem>>, vector<1x4x4xf32>
    %16 = vector.shape_cast %15 : vector<1x4x4xf32> to vector<4x4xf32>
    %cst_8 = arith.constant dense<0.000000e+00> : vector<128x4xf32>
    %17 = tpu.matmul %14, %16, %cst_8 {dimension_numbers = #tpu.dot_dimension_numbers<[1], [0], [0], [1], [0, 0, 1, 1], [], []>} : vector<128x4xf32>, vector<4x4xf32>, vector<128x4xf32> -> vector<128x4xf32>
    %18 = arith.addf %12, %17 : vector<128x4xf32>
    %19 = vector.extract_strided_slice %6 {offsets = [0, 2, 0], sizes = [8, 16, 4], strides = [1, 1, 1]} : vector<8x18x4xf32> to vector<8x16x4xf32>
    %20 = vector.shape_cast %19 : vector<8x16x4xf32> to vector<128x4xf32>
    %c2 = arith.constant 2 : index
    %c0_9 = arith.constant 0 : index
    %c0_10 = arith.constant 0 : index
    %21 = vector.load %arg3[%c2, %c0_9, %c0_10] : memref<9x4x4xf32, #tpu.memory_space<vmem>>, vector<1x4x4xf32>
    %22 = vector.shape_cast %21 : vector<1x4x4xf32> to vector<4x4xf32>
    %cst_11 = arith.constant dense<0.000000e+00> : vector<128x4xf32>
    %23 = tpu.matmul %20, %22, %cst_11 {dimension_numbers = #tpu.dot_dimension_numbers<[1], [0], [0], [1], [0, 0, 1, 1], [], []>} : vector<128x4xf32>, vector<4x4xf32>, vector<128x4xf32> -> vector<128x4xf32>
    %24 = arith.addf %18, %23 : vector<128x4xf32>
    %c1_i32 = arith.constant 1 : i32
    %25 = arith.addi %1, %c1_i32 : i32
    %c0_12 = arith.constant 0 : index
    %26 = arith.index_cast %25 : i32 to index
    %c0_13 = arith.constant 0 : index
    %c0_14 = arith.constant 0 : index
    %27 = vector.load %arg2[%c0_12, %26, %c0_13, %c0_14] : memref<1x18x18x4xf32, #tpu.memory_space<vmem>>, vector<1x8x18x4xf32>
    %28 = vector.shape_cast %27 : vector<1x8x18x4xf32> to vector<8x18x4xf32>
    %29 = vector.extract_strided_slice %28 {offsets = [0, 0, 0], sizes = [8, 16, 4], strides = [1, 1, 1]} : vector<8x18x4xf32> to vector<8x16x4xf32>
    %30 = vector.shape_cast %29 : vector<8x16x4xf32> to vector<128x4xf32>
    %c3 = arith.constant 3 : index
    %c0_15 = arith.constant 0 : index
    %c0_16 = arith.constant 0 : index
    %31 = vector.load %arg3[%c3, %c0_15, %c0_16] : memref<9x4x4xf32, #tpu.memory_space<vmem>>, vector<1x4x4xf32>
    %32 = vector.shape_cast %31 : vector<1x4x4xf32> to vector<4x4xf32>
    %cst_17 = arith.constant dense<0.000000e+00> : vector<128x4xf32>
    %33 = tpu.matmul %30, %32, %cst_17 {dimension_numbers = #tpu.dot_dimension_numbers<[1], [0], [0], [1], [0, 0, 1, 1], [], []>} : vector<128x4xf32>, vector<4x4xf32>, vector<128x4xf32> -> vector<128x4xf32>
    %34 = arith.addf %24, %33 : vector<128x4xf32>
    %35 = vector.extract_strided_slice %28 {offsets = [0, 1, 0], sizes = [8, 16, 4], strides = [1, 1, 1]} : vector<8x18x4xf32> to vector<8x16x4xf32>
    %36 = vector.shape_cast %35 : vector<8x16x4xf32> to vector<128x4xf32>
    %c4 = arith.constant 4 : index
    %c0_18 = arith.constant 0 : index
    %c0_19 = arith.constant 0 : index
    %37 = vector.load %arg3[%c4, %c0_18, %c0_19] : memref<9x4x4xf32, #tpu.memory_space<vmem>>, vector<1x4x4xf32>
    %38 = vector.shape_cast %37 : vector<1x4x4xf32> to vector<4x4xf32>
    %cst_20 = arith.constant dense<0.000000e+00> : vector<128x4xf32>
    %39 = tpu.matmul %36, %38, %cst_20 {dimension_numbers = #tpu.dot_dimension_numbers<[1], [0], [0], [1], [0, 0, 1, 1], [], []>} : vector<128x4xf32>, vector<4x4xf32>, vector<128x4xf32> -> vector<128x4xf32>
    %40 = arith.addf %34, %39 : vector<128x4xf32>
    %41 = vector.extract_strided_slice %28 {offsets = [0, 2, 0], sizes = [8, 16, 4], strides = [1, 1, 1]} : vector<8x18x4xf32> to vector<8x16x4xf32>
    %42 = vector.shape_cast %41 : vector<8x16x4xf32> to vector<128x4xf32>
    %c5 = arith.constant 5 : index
    %c0_21 = arith.constant 0 : index
    %c0_22 = arith.constant 0 : index
    %43 = vector.load %arg3[%c5, %c0_21, %c0_22] : memref<9x4x4xf32, #tpu.memory_space<vmem>>, vector<1x4x4xf32>
    %44 = vector.shape_cast %43 : vector<1x4x4xf32> to vector<4x4xf32>
    %cst_23 = arith.constant dense<0.000000e+00> : vector<128x4xf32>
    %45 = tpu.matmul %42, %44, %cst_23 {dimension_numbers = #tpu.dot_dimension_numbers<[1], [0], [0], [1], [0, 0, 1, 1], [], []>} : vector<128x4xf32>, vector<4x4xf32>, vector<128x4xf32> -> vector<128x4xf32>
    %46 = arith.addf %40, %45 : vector<128x4xf32>
    %c2_i32 = arith.constant 2 : i32
    %47 = arith.addi %1, %c2_i32 : i32
    %c0_24 = arith.constant 0 : index
    %48 = arith.index_cast %47 : i32 to index
    %c0_25 = arith.constant 0 : index
    %c0_26 = arith.constant 0 : index
    %49 = vector.load %arg2[%c0_24, %48, %c0_25, %c0_26] : memref<1x18x18x4xf32, #tpu.memory_space<vmem>>, vector<1x8x18x4xf32>
    %50 = vector.shape_cast %49 : vector<1x8x18x4xf32> to vector<8x18x4xf32>
    %51 = vector.extract_strided_slice %50 {offsets = [0, 0, 0], sizes = [8, 16, 4], strides = [1, 1, 1]} : vector<8x18x4xf32> to vector<8x16x4xf32>
    %52 = vector.shape_cast %51 : vector<8x16x4xf32> to vector<128x4xf32>
    %c6 = arith.constant 6 : index
    %c0_27 = arith.constant 0 : index
    %c0_28 = arith.constant 0 : index
    %53 = vector.load %arg3[%c6, %c0_27, %c0_28] : memref<9x4x4xf32, #tpu.memory_space<vmem>>, vector<1x4x4xf32>
    %54 = vector.shape_cast %53 : vector<1x4x4xf32> to vector<4x4xf32>
    %cst_29 = arith.constant dense<0.000000e+00> : vector<128x4xf32>
    %55 = tpu.matmul %52, %54, %cst_29 {dimension_numbers = #tpu.dot_dimension_numbers<[1], [0], [0], [1], [0, 0, 1, 1], [], []>} : vector<128x4xf32>, vector<4x4xf32>, vector<128x4xf32> -> vector<128x4xf32>
    %56 = arith.addf %46, %55 : vector<128x4xf32>
    %57 = vector.extract_strided_slice %50 {offsets = [0, 1, 0], sizes = [8, 16, 4], strides = [1, 1, 1]} : vector<8x18x4xf32> to vector<8x16x4xf32>
    %58 = vector.shape_cast %57 : vector<8x16x4xf32> to vector<128x4xf32>
    %c7 = arith.constant 7 : index
    %c0_30 = arith.constant 0 : index
    %c0_31 = arith.constant 0 : index
    %59 = vector.load %arg3[%c7, %c0_30, %c0_31] : memref<9x4x4xf32, #tpu.memory_space<vmem>>, vector<1x4x4xf32>
    %60 = vector.shape_cast %59 : vector<1x4x4xf32> to vector<4x4xf32>
    %cst_32 = arith.constant dense<0.000000e+00> : vector<128x4xf32>
    %61 = tpu.matmul %58, %60, %cst_32 {dimension_numbers = #tpu.dot_dimension_numbers<[1], [0], [0], [1], [0, 0, 1, 1], [], []>} : vector<128x4xf32>, vector<4x4xf32>, vector<128x4xf32> -> vector<128x4xf32>
    %62 = arith.addf %56, %61 : vector<128x4xf32>
    %63 = vector.extract_strided_slice %50 {offsets = [0, 2, 0], sizes = [8, 16, 4], strides = [1, 1, 1]} : vector<8x18x4xf32> to vector<8x16x4xf32>
    %64 = vector.shape_cast %63 : vector<8x16x4xf32> to vector<128x4xf32>
    %c8 = arith.constant 8 : index
    %c0_33 = arith.constant 0 : index
    %c0_34 = arith.constant 0 : index
    %65 = vector.load %arg3[%c8, %c0_33, %c0_34] : memref<9x4x4xf32, #tpu.memory_space<vmem>>, vector<1x4x4xf32>
    %66 = vector.shape_cast %65 : vector<1x4x4xf32> to vector<4x4xf32>
    %cst_35 = arith.constant dense<0.000000e+00> : vector<128x4xf32>
    %67 = tpu.matmul %64, %66, %cst_35 {dimension_numbers = #tpu.dot_dimension_numbers<[1], [0], [0], [1], [0, 0, 1, 1], [], []>} : vector<128x4xf32>, vector<4x4xf32>, vector<128x4xf32> -> vector<128x4xf32>
    %68 = arith.addf %62, %67 : vector<128x4xf32>
    %c0_36 = arith.constant 0 : index
    %c0_37 = arith.constant 0 : index
    %69 = vector.load %arg4[%c0_36, %c0_37] : memref<1x4xf32, #tpu.memory_space<vmem>>, vector<1x4xf32>
    %70 = vector.shape_cast %69 : vector<1x4xf32> to vector<4xf32>
    %71 = vector.shape_cast %70 : vector<4xf32> to vector<1x4xf32>
    %72 = vector.broadcast %71 : vector<1x4xf32> to vector<128x4xf32>
    %73 = arith.addf %68, %72 : vector<128x4xf32>
    %c0_38 = arith.constant 0 : index
    %c0_39 = arith.constant 0 : index
    %74 = vector.load %arg5[%c0_38, %c0_39] : memref<4x4xf32, #tpu.memory_space<vmem>>, vector<4x4xf32>
    %cst_40 = arith.constant dense<0.000000e+00> : vector<128x4xf32>
    %75 = tpu.matmul %73, %74, %cst_40 {dimension_numbers = #tpu.dot_dimension_numbers<[1], [0], [0], [1], [0, 0, 1, 1], [], []>} : vector<128x4xf32>, vector<4x4xf32>, vector<128x4xf32> -> vector<128x4xf32>
    %c0_41 = arith.constant 0 : index
    %c0_42 = arith.constant 0 : index
    %76 = vector.load %arg6[%c0_41, %c0_42] : memref<1x4xf32, #tpu.memory_space<vmem>>, vector<1x4xf32>
    %77 = vector.shape_cast %76 : vector<1x4xf32> to vector<4xf32>
    %78 = vector.shape_cast %77 : vector<4xf32> to vector<1x4xf32>
    %79 = vector.broadcast %78 : vector<1x4xf32> to vector<128x4xf32>
    %80 = arith.addf %75, %79 : vector<128x4xf32>
    %cst_43 = arith.constant 5.000000e-01 : f32
    %81 = vector.broadcast %cst_43 : f32 to vector<128x4xf32>
    %82 = arith.mulf %81, %80 : vector<128x4xf32>
    %cst_44 = arith.constant 0.707106769 : f32
    %83 = vector.broadcast %cst_44 : f32 to vector<128x4xf32>
    %84 = arith.mulf %80, %83 : vector<128x4xf32>
    %85 = math.absf %84 : vector<128x4xf32>
    %cst_45 = arith.constant 0.327591091 : f32
    %86 = vector.broadcast %cst_45 : f32 to vector<128x4xf32>
    %87 = arith.mulf %86, %85 : vector<128x4xf32>
    %cst_46 = arith.constant 1.000000e+00 : f32
    %88 = vector.broadcast %cst_46 : f32 to vector<128x4xf32>
    %89 = arith.addf %88, %87 : vector<128x4xf32>
    %cst_47 = arith.constant 1.000000e+00 : f32
    %90 = vector.broadcast %cst_47 : f32 to vector<128x4xf32>
    %91 = arith.divf %90, %89 : vector<128x4xf32>
    %cst_48 = arith.constant 1.06140542 : f32
    %92 = vector.broadcast %cst_48 : f32 to vector<128x4xf32>
    %93 = arith.mulf %91, %92 : vector<128x4xf32>
    %cst_49 = arith.constant -1.45315206 : f32
    %94 = vector.broadcast %cst_49 : f32 to vector<128x4xf32>
    %95 = arith.addf %94, %93 : vector<128x4xf32>
    %96 = arith.mulf %91, %95 : vector<128x4xf32>
    %cst_50 = arith.constant 1.42141378 : f32
    %97 = vector.broadcast %cst_50 : f32 to vector<128x4xf32>
    %98 = arith.addf %97, %96 : vector<128x4xf32>
    %99 = arith.mulf %91, %98 : vector<128x4xf32>
    %cst_51 = arith.constant -0.284496725 : f32
    %100 = vector.broadcast %cst_51 : f32 to vector<128x4xf32>
    %101 = arith.addf %100, %99 : vector<128x4xf32>
    %102 = arith.mulf %91, %101 : vector<128x4xf32>
    %cst_52 = arith.constant 0.254829586 : f32
    %103 = vector.broadcast %cst_52 : f32 to vector<128x4xf32>
    %104 = arith.addf %103, %102 : vector<128x4xf32>
    %105 = arith.mulf %91, %104 : vector<128x4xf32>
    %cst_53 = arith.constant 0.000000e+00 : f32
    %106 = vector.broadcast %cst_53 : f32 to vector<128x4xf32>
    %107 = arith.subf %106, %85 : vector<128x4xf32>
    %108 = arith.mulf %107, %85 : vector<128x4xf32>
    %109 = math.exp %108 : vector<128x4xf32>
    %110 = arith.mulf %105, %109 : vector<128x4xf32>
    %cst_54 = arith.constant 1.000000e+00 : f32
    %111 = vector.broadcast %cst_54 : f32 to vector<128x4xf32>
    %112 = arith.subf %111, %110 : vector<128x4xf32>
    %cst_55 = arith.constant 0.000000e+00 : f32
    %113 = vector.broadcast %cst_55 : f32 to vector<128x4xf32>
    %114 = arith.cmpf olt, %84, %113 : vector<128x4xf32>
    %cst_56 = arith.constant 0.000000e+00 : f32
    %115 = vector.broadcast %cst_56 : f32 to vector<128x4xf32>
    %116 = arith.subf %115, %112 : vector<128x4xf32>
    %117 = arith.select %114, %116, %112 : vector<128x4xi1>, vector<128x4xf32>
    %cst_57 = arith.constant 1.000000e+00 : f32
    %118 = vector.broadcast %cst_57 : f32 to vector<128x4xf32>
    %119 = arith.addf %118, %117 : vector<128x4xf32>
    %120 = arith.mulf %82, %119 : vector<128x4xf32>
    %c0_58 = arith.constant 0 : index
    %c0_59 = arith.constant 0 : index
    %121 = vector.load %arg7[%c0_58, %c0_59] : memref<4x4xf32, #tpu.memory_space<vmem>>, vector<4x4xf32>
    %cst_60 = arith.constant dense<0.000000e+00> : vector<128x4xf32>
    %122 = tpu.matmul %120, %121, %cst_60 {dimension_numbers = #tpu.dot_dimension_numbers<[1], [0], [0], [1], [0, 0, 1, 1], [], []>} : vector<128x4xf32>, vector<4x4xf32>, vector<128x4xf32> -> vector<128x4xf32>
    %c0_61 = arith.constant 0 : index
    %c0_62 = arith.constant 0 : index
    %123 = vector.load %arg8[%c0_61, %c0_62] : memref<1x4xf32, #tpu.memory_space<vmem>>, vector<1x4xf32>
    %124 = vector.shape_cast %123 : vector<1x4xf32> to vector<4xf32>
    %125 = vector.shape_cast %124 : vector<4xf32> to vector<1x4xf32>
    %126 = vector.broadcast %125 : vector<1x4xf32> to vector<128x4xf32>
    %127 = arith.addf %122, %126 : vector<128x4xf32>
    %c0_63 = arith.constant 0 : index
    %c0_64 = arith.constant 0 : index
    %128 = vector.load %arg9[%c0_63, %c0_64] : memref<1x4xf32, #tpu.memory_space<vmem>>, vector<1x4xf32>
    %129 = vector.shape_cast %128 : vector<1x4xf32> to vector<4xf32>
    %130 = vector.shape_cast %129 : vector<4xf32> to vector<1x4xf32>
    %131 = vector.broadcast %130 : vector<1x4xf32> to vector<128x4xf32>
    %132 = arith.mulf %127, %131 : vector<128x4xf32>
    %c1_i32_65 = arith.constant 1 : i32
    %133 = arith.addi %1, %c1_i32_65 : i32
    %c0_66 = arith.constant 0 : index
    %134 = arith.index_cast %133 : i32 to index
    %c0_67 = arith.constant 0 : index
    %c0_68 = arith.constant 0 : index
    %135 = vector.load %arg2[%c0_66, %134, %c0_67, %c0_68] : memref<1x18x18x4xf32, #tpu.memory_space<vmem>>, vector<1x8x18x4xf32>
    %136 = vector.shape_cast %135 : vector<1x8x18x4xf32> to vector<8x18x4xf32>
    %137 = vector.extract_strided_slice %136 {offsets = [0, 1, 0], sizes = [8, 16, 4], strides = [1, 1, 1]} : vector<8x18x4xf32> to vector<8x16x4xf32>
    %138 = vector.shape_cast %132 : vector<128x4xf32> to vector<8x16x4xf32>
    %139 = arith.addf %137, %138 : vector<8x16x4xf32>
    %c0_69 = arith.constant 0 : index
    %c0_70 = arith.constant 0 : index
    %c0_71 = arith.constant 0 : index
    %c0_72 = arith.constant 0 : index
    %140 = vector.load %arg10[%c0_69, %c0_70, %c0_71, %c0_72] : memref<1x8x16x4xf32, #tpu.memory_space<vmem>>, vector<1x8x16x4xf32>
    %141 = vector.shape_cast %140 : vector<1x8x16x4xf32> to vector<8x16x4xf32>
    %142 = vector.shape_cast %139 : vector<8x16x4xf32> to vector<1x8x16x4xf32>
    tpu.vector_store %arg10[%c0_69, %c0_70, %c0_71, %c0_72], %142 {strides = array<i32>} : memref<1x8x16x4xf32, #tpu.memory_space<vmem>>, vector<1x8x16x4xf32>,
    return
  }
  func.func @transform_0(%arg0: i32, %arg1: i32) -> (i32, i32, i32, i32) {
    %c0_i32 = arith.constant 0 : i32
    %c0_i32_0 = arith.constant 0 : i32
    %c0_i32_1 = arith.constant 0 : i32
    %c0_i32_2 = arith.constant 0 : i32
    return %arg0, %c0_i32, %c0_i32_0, %c0_i32_1 : i32, i32, i32, i32
  }
  func.func @transform_1(%arg0: i32, %arg1: i32) -> (i32, i32, i32) {
    %c0_i32 = arith.constant 0 : i32
    %c0_i32_0 = arith.constant 0 : i32
    %c0_i32_1 = arith.constant 0 : i32
    %c0_i32_2 = arith.constant 0 : i32
    return %c0_i32, %c0_i32_0, %c0_i32_1 : i32, i32, i32
  }
  func.func @transform_2(%arg0: i32, %arg1: i32) -> (i32, i32) {
    %c0_i32 = arith.constant 0 : i32
    %c0_i32_0 = arith.constant 0 : i32
    %c0_i32_1 = arith.constant 0 : i32
    return %c0_i32, %c0_i32_0 : i32, i32
  }
  func.func @transform_3(%arg0: i32, %arg1: i32) -> (i32, i32) {
    %c0_i32 = arith.constant 0 : i32
    %c0_i32_0 = arith.constant 0 : i32
    %c0_i32_1 = arith.constant 0 : i32
    return %c0_i32, %c0_i32_0 : i32, i32
  }
  func.func @transform_4(%arg0: i32, %arg1: i32) -> (i32, i32) {
    %c0_i32 = arith.constant 0 : i32
    %c0_i32_0 = arith.constant 0 : i32
    %c0_i32_1 = arith.constant 0 : i32
    return %c0_i32, %c0_i32_0 : i32, i32
  }
  func.func @transform_5(%arg0: i32, %arg1: i32) -> (i32, i32) {
    %c0_i32 = arith.constant 0 : i32
    %c0_i32_0 = arith.constant 0 : i32
    %c0_i32_1 = arith.constant 0 : i32
    return %c0_i32, %c0_i32_0 : i32, i32
  }
  func.func @transform_6(%arg0: i32, %arg1: i32) -> (i32, i32) {
    %c0_i32 = arith.constant 0 : i32
    %c0_i32_0 = arith.constant 0 : i32
    %c0_i32_1 = arith.constant 0 : i32
    return %c0_i32, %c0_i32_0 : i32, i32
  }
  func.func @transform_7(%arg0: i32, %arg1: i32) -> (i32, i32) {
    %c0_i32 = arith.constant 0 : i32
    %c0_i32_0 = arith.constant 0 : i32
    %c0_i32_1 = arith.constant 0 : i32
    return %c0_i32, %c0_i32_0 : i32, i32
  }
  func.func @transform_8(%arg0: i32, %arg1: i32) -> (i32, i32, i32, i32) {
    %c0_i32 = arith.constant 0 : i32
    %c0_i32_0 = arith.constant 0 : i32
    %c0_i32_1 = arith.constant 0 : i32
    return %arg0, %arg1, %c0_i32, %c0_i32_0 : i32, i32, i32, i32
  }
}

</mosaic_0001>

<bundles_post_ra>
// kernel: tpu_custom_call.1
= control target key start
LH: loop header
LB: loop body
LE: loop exit
PB: predicated region body
PF: predicated region fallthrough
CT: control target
= control target key end

     0   :  { %s4660_s27 = smov 0   ;;  %s4662_s28 = smov 0   ;;  %s5924_s0 = inlined_call_operand.vmem [shape: f32[2,18,18,4], index: 0, kind: input, shape index: {}]   ;;  %s5925_s1 = inlined_call_operand.vmem [shape: f32[9,4,4], index: 1, kind: input, shape index: {}]   ;;  %s5926_s2 = inlined_call_operand.vmem [shape: f32[1,4], index: 2, kind: input, shape index: {}]   ;;  %s5927_s3 = inlined_call_operand.vmem [shape: f32[4,4], index: 3, kind: input, shape index: {}]   ;;  %s5928_s4 = inlined_call_operand.vmem [shape: f32[1,4], index: 4, kind: input, shape index: {}]   ;;  %s5929_s5 = inlined_call_operand.vmem [shape: f32[4,4], index: 5, kind: input, shape index: {}]   ;;  %s5930_s6 = inlined_call_operand.vmem [shape: f32[1,4], index: 6, kind: input, shape index: {}]   ;;  %s5931_s7 = inlined_call_operand.vmem [shape: f32[1,4], index: 7, kind: input, shape index: {}]   ;;  %s5932_s8 = inlined_call_operand.vmem [shape: f32[2,16,16,4], index: 8, kind: output, shape index: {}]  }
   0x1   :  { %s4664_s29 = smov 0   ;;  %s4666_s30 = smov 0  }
   0x2   :  { %s4668_s9 = smov 0  }
   0x3 LB: > { %s27_s10 = sadd.s32 1, %s4605_s29  ;;  %s30_s11 = sadd.s32 1, %s4609_s30  ;;  %s4613_s9 = sphi %s4668_s9, %s18_s9   ;;  %s4609_s30 = sphi %s4666_s30, %s6004_s30   ;;  %s4605_s29 = sphi %s4664_s29, %s6003_s29   ;;  %s4601_s28 = sphi %s4662_s28, %s6002_s28   ;;  %s4597_s27 = sphi %s4660_s27, %s6001_s27  }
   0x4   : > { %p28_p0 = scmp.ge.s32.totalorder %s27_s10, 2  ;;  %p3582_p1 = scmp.ge.s32.totalorder %s4613_s9, 1 }
   0x5   : > { %p276_p2 = scmp.lt.s32.totalorder %s4613_s9, 5 }
   0x6   : > { %s6006_s10 = smov (%p28_p0, %s27_s10), 0  ;;  %s6008_s11 = smov (!%p28_p0, %s30_s11), %s4609_s30 }
   0x7   : > { %p277_p3 = pnand %p3582_p1, %p276_p2  ;;  %p32_p4 = scmp.ge.s32.totalorder %s6008_s11, 2 }
   0x9   : > { %s6010_s11 = smov (%p32_p4, %s6008_s11), 0  ;;  %280 = sbr.rel (%p277_p3) target bundleno = 943 (0x3af), region = 52 }
  0x10   : > { %vm459_vm0 = vcmask 1043456   ;;  %v4695_v0 = vld [vmem:[%s5925_s1 + $0xc] sm:$0xf]  ;;  %p315_p5 = scmp.lt.s32.totalorder %s4601_s28, 1  ;;  %v3687_v1 = vld [vmem:[%s5925_s1 + $0x10] sm:$0xf] }
  0x11   : > { %4108 = vmatprep.subr.msk.mxu0 %vm459_vm0, %v4695_v0  ;;  %v3590_v2 = vld [vmem:[%s5925_s1 + $0x4] sm:$0xf]  ;;  %v358_v3 = vld [vmem:[%s5925_s1] sm:$0xf]  ;;  %s3589_s20 = smul.u32 192, %s4597_s27  ;;  %vm426_vm1 = vcmask 31744  }
  0x12   : > { %4109 = vmatpush3.msk.msra.mxu0 %vm459_vm0, %v4695_v0  ;;  %s6012_s28 = smov (!%p315_p5, %s4601_s28), 1  ;;  %4030 = vmatprep.subr.msk.mxu1 %vm459_vm0, %v3590_v2  ;;  %vm383_vm2 = vcmask 1046528   ;;  %v4745_v11 = vld [vmem:[%s5925_s1 + $0x14] sm:$0xf]  ;;  %v4787_v26 = vld [vmem:[%s5925_s1 + $0x8] sm:$0xf] }
  0x13   : > { %4134 = vmatprep.subr.msk.mxu0 %vm459_vm0, %v3687_v1  ;;  %4031 = vmatpush3.msk.msra.mxu1 %vm459_vm0, %v3590_v2  ;;  %s4446_s21 = smul.u32 432, %s6012_s28  ;;  %v4885_v58 = vld [vmem:[%s5925_s1 + $0x18] sm:$0xf]  ;;  %vm788_vm3 = vcmask 1045504   ;;  %s3584_s15 = sshll.u32 %s4597_s27, 3 }
  0x14   : > { %4056 = vmatprep.subr.msk.mxu1 %vm459_vm0, %v358_v3  ;;  %p323_p6 = scmp.lt.s32.totalorder %s3584_s15, 15  ;;  %s3586_s17 = sshll.u32 %s6012_s28, 5 }
  0x15   : > { %s319_s24 = scalar_lea.vmem %s5924_s0, %s4446_s21 }
  0x16   : > { %s4721_s25 = scalar_lea.vmem %s319_s24, %s3589_s20  ;;  %s6014_s15 = smov (!%p323_p6, %s3584_s15), 15 }
  0x17   : > { %v4724_v4 = vld [vmem:[%s4721_s25 + $0x18] sm:$0xff]  ;;  %v4727_v5 = vld [vmem:[%s4721_s25 + $0x20] sm:$0xff]  ;;  %v4737_v9 = vld [vmem:[%s4721_s25 + $0x8] sm:$0xff]  ;;  %s3585_s16 = sshll.u32 %s6014_s15, 1 }
  0x18   : > { %v4730_v6 = vld [vmem:[%s4721_s25] sm:$0xff]  ;;  %4110 = vmatprep.mubr.msk.f32.mxu0 %vm426_vm1, %v4724_v4  ;;  %v1276_v7 = vrot.slane %v4724_v4, 1  ;;  %v1277_v8 = vrot.slane %v4727_v5, 1  ;;  %v4740_v10 = vld [vmem:[%s4721_s25 + $0x30] sm:$0xff]  ;;  %v385_v13 = vrot.slane %v4737_v9, 1  ;;  %v4760_v17 = vld [vmem:[%s4721_s25 + $0x38] sm:$0xff]  ;;  %s327_s20 = sadd.s32 %s3586_s17, %s3585_s16 }
  0x19   : > { %4111 = vmatmul.mubr.msk.f32.vlgmr.msra.gmra.mrb[0].mxu0 %vm426_vm1, %v4727_v5  ;;  %v384_v12 = vrot.slane %v4730_v6, 1  ;;  %v4752_v14 = vld [vmem:[%s4721_s25 + $0x10] sm:$0x3]  ;;  %v1281_v16 = vrot.slane %v4740_v10, 1  ;;  %v4763_v18 = vld [vmem:[%s4721_s25 + $0x28] sm:$0x3] }
  0x1a   : > { %5957 = vst [vmem:[#allocation2_spill] sm:$0xff] %v4752_v14  ;;  %4135 = vmatpush3.msk.msra.mxu0 %vm459_vm0, %v3687_v1  ;;  %v387_v15 = vrot.slane %v4752_v14, 1  ;;  %4113 = vmatprep.mubr.msk.f32.mxu0 %vm426_vm1, %v4740_v10  ;;  %5958 = vst [vmem:[#allocation3_spill] sm:$0xff] %v4763_v18  ;;  %v4767_v20 = vrot.slane %v4760_v17, 1  ;;  %v391_v21 = vsel %vm383_vm2, %v1276_v7, %v1277_v8  ;;  %v392_v22 = vrot.slane %v4763_v18, 1  ;;  %v4772_v23 = vld [vmem:[%s4721_s25 + $0x48] sm:$0xff] }
  0x1b   : > { %v386_v19 = vsel %vm383_vm2, %v384_v12, %v385_v13  ;;  %v4775_v24 = vld [vmem:[%s4721_s25 + $0x40] sm:$0x3]  ;;  %4160 = vmatprep.subr.msk.mxu0 %vm459_vm0, %v4745_v11  ;;  %v1286_v28 = vrot.slane %v4772_v23, 1  ;;  %v4795_v29 = vld [vmem:[%s4721_s25 + $0x50] sm:$0xff]  ;;  %v4809_v34 = vld [vmem:[%s4721_s25 + $0x58] sm:$0x3] }
  0x1c   : > { %5959 = vst [vmem:[#allocation4_spill] sm:$0xff] %v4775_v24  ;;  %4032 = vmatprep.mubr.msk.f32.mxu1 %vm426_vm1, %v386_v19  ;;  %v388_v25 = vsel %vm383_vm2, %v385_v13, %v387_v15  ;;  %v393_v27 = vsel %vm383_vm2, %v1277_v8, %v392_v22  ;;  %v397_v30 = vrot.slane %v4775_v24, 1  ;;  %v4799_v31 = vrot.slane %v4795_v29, 1  ;;  %v4806_v33 = vld [vmem:[%s4721_s25 + $0x60] sm:$0xff]  ;;  %5961 = vst [vmem:[#allocation6_spill] sm:$0xff] %v4809_v34  ;;  %v4827_v37 = vld [vmem:[%s4721_s25 + $0x68] sm:$0xff] }
  0x1d   : > { %4033 = vmatmul.mubr.msk.f32.vlgmr.msra.gmra.mrb[0].mxu1 %vm426_vm1, %v388_v25  ;;  %4114 = vmatmul.mubr.msk.f32.gmra.mrb[2].mxu0 %vm426_vm1, %v4760_v17  ;;  %v4803_v32 = vsel %vm383_vm2, %v1281_v16, %v4767_v20  ;;  %v4812_v35 = vld [vmem:[%s4721_s25 + $0x28] sm:$0x3]  ;;  %v402_v38 = vrot.slane %v4809_v34, 1  ;;  %v1291_v40 = vrot.slane %v4806_v33, 1  ;;  %v4833_v41 = vrot.slane %v4827_v37, 1  ;;  %v4846_v45 = vld [vmem:[%s4721_s25 + $0x78] sm:$0xff] }
  0x1e   : > { %4035 = vmatprep.mubr.msk.f32.mxu1 %vm426_vm1, %v391_v21  ;;  %4116 = vmatprep.mubr.msk.f32.mxu0 %vm426_vm1, %v4772_v23  ;;  %5960 = vst [vmem:[#allocation5_spill] sm:$0xff] %v4803_v32  ;;  %v398_v36 = vsel %vm383_vm2, %v4767_v20, %v397_v30  ;;  %v1279_v39 = vrot.slane %v4812_v35, 1  ;;  %v4837_v42 = vsel %vm383_vm2, %v1286_v28, %v4799_v31  ;;  %v4840_v43 = vld [vmem:[%s4721_s25 + $0x70] sm:$0x3]  ;;  %v4843_v44 = vld [vmem:[%s4721_s25 + $0x40] sm:$0x3] }
  0x1f   : > { %4057 = vmatpush3.msk.msra.mxu1 %vm459_vm0, %v358_v3  ;;  %5962 = vst [vmem:[#allocation7_spill] sm:$0xff] %v4837_v42  ;;  %5963 = vst [vmem:[#allocation8_spill] sm:$0xff] %v4840_v43  ;;  %v4849_v46 = vld [vmem:[%s4721_s25 + $0x80] sm:$0xff]  ;;  %v403_v47 = vsel %vm383_vm2, %v4799_v31, %v402_v38  ;;  %v407_v49 = vrot.slane %v4840_v43, 1  ;;  %v1284_v50 = vrot.slane %v4843_v44, 1  ;;  %v4864_v51 = vsel %vm383_vm2, %v1291_v40, %v4833_v41  ;;  %v4877_v56 = vld [vmem:[%s4721_s25 + $0x90] sm:$0xff] }
  0x20   : > { %4082 = vmatprep.subr.msk.mxu1 %vm459_vm0, %v4787_v26  ;;  %v1280_v48 = vsel %vm383_vm2, %v1277_v8, %v1279_v39  ;;  %5964 = vst [vmem:[#allocation9_spill] sm:$0xff] %v4864_v51  ;;  %v409_v52 = vrot.slane %v4846_v45, 1  ;;  %v4868_v53 = vrot.slane %v4849_v46, 1  ;;  %v4871_v54 = vld [vmem:[%s4721_s25 + $0x88] sm:$0x3]  ;;  %v4880_v57 = vld [vmem:[%s4721_s25 + $0x98] sm:$0xff] }
  0x21   : > { %4036 = vmatmul.mubr.msk.f32.gmra.mrb[2].mxu1 %vm426_vm1, %v393_v27  ;;  %4117 = vmatmul.mubr.msk.f32.gmra.mrb[4].mxu0 %vm426_vm1, %v4795_v29  ;;  %5965 = vst [vmem:[#allocation10_spill] sm:$0xff] %v4871_v54  ;;  %v4874_v55 = vld [vmem:[%s4721_s25 + $0x58] sm:$0x3]  ;;  %5966 = vst [vmem:[#allocation11_spill] sm:$0xff] %v4880_v57  ;;  %v408_v59 = vsel %vm383_vm2, %v4833_v41, %v407_v49  ;;  %v1285_v60 = vsel %vm383_vm2, %v4767_v20, %v1284_v50  ;;  %v412_v61 = vrot.slane %v4871_v54, 1  ;;  %v4918_v8 = vld [vmem:[%s4721_s25 + $0xa8] sm:$0xff] }
  0x22   : > { %4038 = vmatprep.mubr.msk.f32.mxu1 %vm426_vm1, %v4803_v32  ;;  %4119 = vmatprep.mubr.msk.f32.mxu0 %vm426_vm1, %v4806_v33  ;;  %v1289_v62 = vrot.slane %v4874_v55, 1  ;;  %v4903_v63 = vsel %vm383_vm2, %v409_v52, %v4868_v53  ;;  %v414_v1 = vrot.slane %v4877_v56, 1  ;;  %v4907_v2 = vrot.slane %v4880_v57, 1  ;;  %v4910_v3 = vld [vmem:[%s4721_s25 + $0xa0] sm:$0x3]  ;;  %5969 = vst [vmem:[#allocation14_spill] sm:$0xff] %v4918_v8 }
  0x23   : > { %5967 = vst [vmem:[#allocation12_spill] sm:$0xff] %v4903_v63  ;;  %5968 = vst [vmem:[#allocation13_spill] sm:$0xff] %v4910_v3  ;;  %v4913_v7 = vld [vmem:[%s4721_s25 + $0x70] sm:$0x3]  ;;  %v4926_v12 = vld [vmem:[%s4721_s25 + $0xb8] sm:$0x3]  ;;  %v413_v15 = vsel %vm383_vm2, %v4868_v53, %v412_v61 }
  0x24   : > { %5971 = vst [vmem:[#allocation16_spill] sm:$0xff] %v4926_v12  ;;  %v4929_v13 = vld [vmem:[%s4721_s25 + $0x88] sm:$0x3]  ;;  %v1290_v16 = vsel %vm383_vm2, %v4799_v31, %v1289_v62  ;;  %v417_v19 = vrot.slane %v4910_v3, 1  ;;  %v4942_v22 = vld [vmem:[%s4721_s25 + $0xa0] sm:$0x3]  ;;  %v4949_v27 = vsel %vm383_vm2, %v414_v1, %v4907_v2 }
  0x25   : > { %4039 = vmatmul.mubr.msk.f32.gmra.mrb[4].mxu1 %vm426_vm1, %v398_v36  ;;  %4120 = vmatmul.mubr.msk.f32.gmra.mrb[6].mxu0 %vm426_vm1, %v4827_v37  ;;  %5972 = vst [vmem:[#allocation17_spill] sm:$0xff] %v4929_v13  ;;  %5973 = vst [vmem:[#allocation18_spill] sm:$0xff] %v4942_v22  ;;  %v4945_v25 = vld [vmem:[%s4721_s25 + $0xb8] sm:$0x3]  ;;  %v419_v28 = vrot.slane %v4918_v8, 1  ;;  %v422_v36 = vrot.slane %v4926_v12, 1 }
  0x26   : > { %4041 = vmatprep.mubr.msk.f32.mxu1 %vm426_vm1, %v4837_v42  ;;  %4136 = vmatprep.mubr.msk.f32.mxu0 %vm426_vm1, %v391_v21  ;;  %v1294_v21 = vrot.slane %v4913_v7, 1  ;;  %5974 = vst [vmem:[#allocation19_spill] sm:$0xff] %v4945_v25  ;;  %v1299_v38 = vrot.slane %v4929_v13, 1  ;;  %v1304_v39 = vrot.slane %v4942_v22, 1  ;;  %v1309_v40 = vrot.slane %v4945_v25, 1  ;;  %v4985_v61 = vld [vmem:[%s4721_s25 + $0xd8] sm:$0xff] }
  0x27   : > { %v4968_v49 = vrot.slane %v4760_v17, 2  ;;  %v4971_v50 = vrot.slane %v4795_v29, 2  ;;  %v418_v52 = vsel %vm383_vm2, %v4907_v2, %v417_v19  ;;  %5976 = vst [vmem:[#allocation21_spill] sm:$0xff] %v4985_v61  ;;  %v4988_v62 = vrot.slane %v4827_v37, 2  ;;  %v3730_v19 = vld [vmem:[%s4721_s25 + $0x58] sm:$0x3] }
  0x28   : > { %v3736_v12 = vld [vmem:[%s4721_s25 + $0x88] sm:$0x3]  ;;  %v1305_v3 = vsel %vm383_vm2, %v4907_v2, %v1304_v39  ;;  %v3739_v54 = vld [vmem:[%s4721_s25 + $0xa0] sm:$0x3]  ;;  %v3742_v43 = vld [vmem:[%s4721_s25 + $0xb8] sm:$0x3] }
  0x29   : > { %4042 = vmatmul.mubr.msk.f32.gmra.mrb[6].mxu1 %vm426_vm1, %v403_v47  ;;  %4137 = vmatmul.mubr.msk.f32.vlgmr.msra.gmra.mrb[0].mxu0 %vm426_vm1, %v1280_v48  ;;  %v4962_v47 = vld [vmem:[%s4721_s25 + $0xc0] sm:$0xff]  ;;  %v4965_v48 = vld [vmem:[%s4721_s25 + $0xc8] sm:$0xff]  ;;  %v5027_v39 = vrot.slane %v4880_v57, 2  ;;  %v2274_v24 = vrot.slane %v4985_v61, 2  ;;  %v2009_v18 = vrot.slane %v3730_v19, 1  ;;  %v2019_v8 = vrot.slane %v3736_v12, 1 }
  0x2a   : > { %4161 = vmatpush3.msk.msra.mxu0 %vm459_vm0, %v4745_v11  ;;  %4044 = vmatprep.mubr.msk.f32.mxu1 %vm426_vm1, %v4864_v51  ;;  %v4921_v11 = vld [vmem:[%s4721_s25 + $0xb0] sm:$0xff]  ;;  %5975 = vst [vmem:[#allocation20_spill] sm:$0xff] %v4965_v48  ;;  %v5035_v34 = vrot.slane %v4965_v48, 2  ;;  %v2024_v14 = vrot.slane %v3739_v54, 1  ;;  %v2029_v13 = vrot.slane %v3742_v43, 1  ;;  %s3587_s27 = sshll.u32 %s327_s20, 3 }
  0x2b   : > { %4139 = vmatprep.mubr.msk.f32.mxu0 %vm426_vm1, %v4803_v32  ;;  %4186 = vmatprep.subr.msk.mxu0 %vm459_vm0, %v4885_v58  ;;  %5970 = vst [vmem:[#allocation15_spill] sm:$0xff] %v4921_v11  ;;  %v4953_v30 = vrot.slane %v4921_v11, 1  ;;  %v5005_v32 = vrot.slane %v4965_v48, 1  ;;  %v5047_v48 = vsel %vm383_vm2, %v4799_v31, %v2009_v18  ;;  %s5800_s24 = scalar_lea.vmem %s5932_s8, %s3587_s27 }
  0x2c   : > { %v5066_v18 = vsel %vm383_vm2, %v4907_v2, %v2024_v14 }
  0x2d   : > { %4045 = vmatmul.mubr.msk.f32.gmra.mrb[8].mxu1 %vm426_vm1, %v408_v59  ;;  %4140 = vmatmul.mubr.msk.f32.gmra.mrb[2].mxu0 %vm426_vm1, %v1285_v60  ;;  %v1295_v59 = vsel %vm383_vm2, %v4833_v41, %v1294_v21  ;;  %v4982_v60 = vld [vmem:[%s4721_s25 + $0xd0] sm:$0x3]  ;;  %v4992_v1 = vsel %vm383_vm2, %v419_v28, %v4953_v30  ;;  %v423_v21 = vsel %vm383_vm2, %v4953_v30, %v422_v36 }
  0x2e   : > { %4047 = vmatprep.mubr.msk.f32.mxu1 %vm426_vm1, %v4903_v63  ;;  %4142 = vmatprep.mubr.msk.f32.mxu0 %vm426_vm1, %v4837_v42  ;;  %v3733_v28 = vld [vmem:[%s4721_s25 + $0x70] sm:$0x3]  ;;  %v1310_v36 = vsel %vm383_vm2, %v4953_v30, %v1309_v40  ;;  %v2036_v42 = vrot.slane %v4985_v61, 1  ;;  %v5030_v40 = vrot.slane %v4921_v11, 2 }
  0x2f   : > { %v2014_v22 = vrot.slane %v3733_v28, 1 }
  0x31   : > { %4048 = vmatmul.mubr.msk.f32.gmra.mrb[10].mxu1 %vm426_vm1, %v413_v15  ;;  %4143 = vmatmul.mubr.msk.f32.gmra.mrb[4].mxu0 %vm426_vm1, %v1290_v16  ;;  %v4995_v15 = vld [vmem:[%s4721_s25 + $0xe0] sm:$0xff] }
  0x32   : > { %4050 = vmatprep.mubr.msk.f32.mxu1 %vm426_vm1, %v4949_v27  ;;  %4145 = vmatprep.mubr.msk.f32.mxu0 %vm426_vm1, %v4864_v51  ;;  %v3727_v16 = vld [vmem:[%s4721_s25 + $0x40] sm:$0x3]  ;;  %v1300_v51 = vsel %vm383_vm2, %v4868_v53, %v1299_v38  ;;  %v3745_v38 = vld [vmem:[%s4721_s25 + $0xd0] sm:$0x3]  ;;  %v2275_v14 = vrot.slane %v4995_v15, 2 }
  0x33   : > { %v2004_v25 = vrot.slane %v3727_v16, 1  ;;  %v2034_v61 = vrot.slane %v3745_v38, 1 }
  0x35   : > { %4051 = vmatmul.mubr.msk.f32.gmra.mrb[12].mxu1 %vm426_vm1, %v418_v52  ;;  %4146 = vmatmul.mubr.msk.f32.gmra.mrb[6].mxu0 %vm426_vm1, %v1295_v59  ;;  %v5024_v52 = vrot.slane %v4849_v46, 2  ;;  %v2037_v59 = vrot.slane %v4995_v15, 1  ;;  %v5043_v11 = vsel %vm383_vm2, %v4767_v20, %v2004_v25  ;;  %v5062_v20 = vsel %vm383_vm2, %v4868_v53, %v2019_v8 }
  0x36   : > { %4053 = vmatprep.mubr.msk.f32.mxu1 %vm426_vm1, %v4992_v1  ;;  %4148 = vmatprep.mubr.msk.f32.mxu0 %vm426_vm1, %v4903_v63  ;;  %v3748_v63 = vld [vmem:[%s4721_s25 + $0xe8] sm:$0x3]  ;;  %v5074_v25 = vsel %vm383_vm2, %v5005_v32, %v2034_v61  ;;  %v2252_v53 = vrot.slane %v3733_v28, 2  ;;  %v2257_v8 = vrot.slane %v3736_v12, 2  ;;  %v2272_v61 = vrot.slane %v3745_v38, 2 }
  0x37   : > { %v5050_v57 = vsel %vm383_vm2, %v2036_v42, %v2037_v59  ;;  %v2039_v31 = vrot.slane %v3748_v63, 1  ;;  %v5070_v42 = vsel %vm383_vm2, %v4953_v30, %v2029_v13  ;;  %v2267_v30 = vrot.slane %v3742_v43, 2 }
  0x38   : > { %5977 = vst [vmem:[#allocation22_spill] sm:$0xff] %v5050_v57  ;;  %v2262_v57 = vrot.slane %v3739_v54, 2  ;;  %v5097_v54 = vsel %vm788_vm3, %v4988_v62, %v2252_v53  ;;  %v1514_v43 = vrot.slane %v4724_v4, 2  ;;  %v5167_v53 = vld [vmem:[%s5925_s1 + $0x1c] sm:$0xf] }
  0x39   : > { %4054 = vmatmul.mubr.msk.f32.gmra.mrb[14].mxu1 %vm426_vm1, %v423_v21  ;;  %4149 = vmatmul.mubr.msk.f32.gmra.mrb[8].mxu0 %vm426_vm1, %v1300_v51  ;;  %v5058_v51 = vsel %vm383_vm2, %v4833_v41, %v2014_v22  ;;  %v2242_v21 = vrot.slane %v3727_v16, 2  ;;  %v2247_v41 = vrot.slane %v3730_v19, 2  ;;  %v5077_v22 = vsel %vm383_vm2, %v2037_v59, %v2039_v31 }
  0x3a   : > { %4058 = vmatprep.mubr.msk.f32.mxu1 %vm426_vm1, %v4730_v6  ;;  %4151 = vmatprep.mubr.msk.f32.mxu0 %vm426_vm1, %v4949_v27  ;;  %v5105_v12 = vsel %vm788_vm3, %v5027_v39, %v2262_v57  ;;  %v5109_v16 = vrot.slane %v4727_v5, 2  ;;  %v5978_v19 = vrot.slane %v4962_v47, 1  ;;  %v5121_v59 = vsel %vm788_vm3, %v5030_v40, %v2267_v30 }
  0x3b   : > { %v5085_v2 = vsel %vm788_vm3, %v4968_v49, %v2242_v21  ;;  %v5089_v13 = vsel %vm788_vm3, %v4971_v50, %v2247_v41  ;;  %v5133_v57 = vsel %vm788_vm3, %v2274_v24, %v2275_v14  ;;  %v1517_v31 = vrot.slane %v4812_v35, 2 }
  0x3c   : > { %v5115_v28 = vsel %vm383_vm2, %v5978_v19, %v5005_v32  ;;  %v2277_v21 = vrot.slane %v3748_v63, 2  ;;  %v1519_v24 = vrot.slane %v4740_v10, 2  ;;  %v1522_v35 = vrot.slane %v4843_v44, 2  ;;  %v5980_v19 = vld [vmem:[#allocation17_spill] sm:$0xff] }
  0x3d   : > { %4059 = vmatmul.mubr.msk.f32.vlgmr.msra.gmra.mrb[0].mxu1 %vm426_vm1, %v4737_v9  ;;  %4152 = vmatmul.mubr.msk.f32.gmra.mrb[10].mxu0 %vm426_vm1, %v1305_v3  ;;  %v5101_v3 = vsel %vm788_vm3, %v5024_v52, %v2257_v8  ;;  %v1524_v63 = vrot.slane %v4772_v23, 2  ;;  %v1527_v8 = vrot.slane %v4874_v55, 2 }
  0x3e   : > { %4061 = vmatprep.mubr.msk.f32.mxu1 %vm426_vm1, %v4724_v4  ;;  %4154 = vmatprep.mubr.msk.f32.mxu0 %vm426_vm1, %v4992_v1  ;;  %v5127_v4 = vsel %vm788_vm3, %v5035_v34, %v2272_v61  ;;  %v5162_v41 = vsel %vm788_vm3, %v1519_v24, %v4968_v49  ;;  %v1523_v44 = vsel %vm788_vm3, %v4968_v49, %v1522_v35  ;;  %v1539_v24 = vrot.slane %v4877_v56, 2  ;;  %v5982_v35 = vld [vmem:[#allocation2_spill] sm:$0xff] }
  0x3f   : > { %4083 = vmatpush3.msk.msra.mxu1 %vm459_vm0, %v4787_v26  ;;  %v5979_v26 = vrot.slane %v4982_v60, 1  ;;  %v5184_v30 = vsel %vm788_vm3, %v1524_v63, %v4971_v50  ;;  %v1528_v55 = vsel %vm788_vm3, %v4971_v50, %v1527_v8  ;;  %v792_v63 = vrot.slane %v5982_v35, 2  ;;  %v5984_v8 = vld [vmem:[#allocation18_spill] sm:$0xff] }
  0x40   : > { %4316 = vmatprep.subr.msk.mxu1 %vm459_vm0, %v4695_v0 }
  0x41   : > { %4062 = vmatmul.mubr.msk.f32.gmra.mrb[2].mxu1 %vm426_vm1, %v4727_v5  ;;  %4155 = vmatmul.mubr.msk.f32.gmra.mrb[12].mxu0 %vm426_vm1, %v1310_v36  ;;  %v1315_v38 = vsel %vm383_vm2, %v5005_v32, %v5979_v26  ;;  %v1516_v5 = vsel %vm788_vm3, %v1514_v43, %v5109_v16  ;;  %v5148_v36 = vsel %vm788_vm3, %v2275_v14, %v2277_v21  ;;  %v1529_v14 = vrot.slane %v4806_v33, 2 }
  0x42   : > { %4064 = vmatprep.mubr.msk.f32.mxu1 %vm426_vm1, %v4740_v10  ;;  %4157 = vmatprep.mubr.msk.f32.mxu0 %vm426_vm1, %v5115_v28  ;;  %v1518_v32 = vsel %vm788_vm3, %v5109_v16, %v1517_v31  ;;  %v1534_v43 = vrot.slane %v4846_v45, 2  ;;  %v1537_v26 = vrot.slane %v5980_v19, 2  ;;  %v789_v31 = vrot.slane %v4730_v6, 2 }
  0x43   : > { %v5200_v61 = vsel %vm788_vm3, %v1529_v14, %v4988_v62  ;;  %v790_v21 = vrot.slane %v4737_v9, 2  ;;  %v1542_v9 = vrot.slane %v5984_v8, 2 }
  0x44   : > { %v1538_v6 = vsel %vm788_vm3, %v5024_v52, %v1537_v26  ;;  %v5986_v26 = vld [vmem:[#allocation3_spill] sm:$0xff] }
  0x45   : > { %4065 = vmatmul.mubr.msk.f32.gmra.mrb[4].mxu1 %vm426_vm1, %v4760_v17  ;;  %4158 = vmatmul.mubr.msk.f32.gmra.mrb[14].mxu0 %vm426_vm1, %v1315_v38  ;;  %v5215_v38 = vsel %vm788_vm3, %v1534_v43, %v5024_v52  ;;  %v791_v14 = vsel %vm788_vm3, %v789_v31, %v790_v21  ;;  %v5985_v43 = vld [vmem:[#allocation15_spill] sm:$0xff]  ;;  %v1543_v19 = vsel %vm788_vm3, %v5027_v39, %v1542_v9  ;;  %v797_v31 = vrot.slane %v5986_v26, 2  ;;  %v5988_v9 = vld [vmem:[#allocation4_spill] sm:$0xff] }
  0x46   : > { %4067 = vmatprep.mubr.msk.f32.mxu1 %vm426_vm1, %v4772_v23  ;;  %4162 = vmatprep.mubr.msk.f32.mxu0 %vm426_vm1, %v1516_v5 }
  0x49   : > { %4068 = vmatmul.mubr.msk.f32.gmra.mrb[6].mxu1 %vm426_vm1, %v4795_v29  ;;  %4163 = vmatmul.mubr.msk.f32.vlgmr.msra.gmra.mrb[0].mxu0 %vm426_vm1, %v1518_v32  ;;  %v5981_v32 = vld [vmem:[#allocation11_spill] sm:$0xff] }
  0x4a   : > { %4187 = vmatpush3.msk.msra.mxu0 %vm459_vm0, %v4885_v58  ;;  %4070 = vmatprep.mubr.msk.f32.mxu1 %vm426_vm1, %v4806_v33  ;;  %v1532_v58 = vrot.slane %v4913_v7, 2 }
  0x4b   : > { %4165 = vmatprep.mubr.msk.f32.mxu0 %vm426_vm1, %v5162_v41  ;;  %4212 = vmatprep.subr.msk.mxu0 %vm459_vm0, %v5167_v53 }
  0x4c   : > { %v1533_v7 = vsel %vm788_vm3, %v4988_v62, %v1532_v58 }
  0x4d   : > { %4071 = vmatmul.mubr.msk.f32.gmra.mrb[8].mxu1 %vm426_vm1, %v4827_v37  ;;  %4166 = vmatmul.mubr.msk.f32.gmra.mrb[2].mxu0 %vm426_vm1, %v1523_v44  ;;  %v5983_v44 = vld [vmem:[#allocation14_spill] sm:$0xff] }
  0x4e   : > { %4073 = vmatprep.mubr.msk.f32.mxu1 %vm426_vm1, %v4846_v45  ;;  %4168 = vmatprep.mubr.msk.f32.mxu0 %vm426_vm1, %v5184_v30  ;;  %v1544_v58 = vrot.slane %v5983_v44, 2 }
  0x50   : > { %v5250_v8 = vsel %vm788_vm3, %v1544_v58, %v5030_v40  ;;  %v1552_v58 = vrot.slane %v4982_v60, 2 }
  0x51   : > { %4074 = vmatmul.mubr.msk.f32.gmra.mrb[10].mxu1 %vm426_vm1, %v4849_v46  ;;  %4169 = vmatmul.mubr.msk.f32.gmra.mrb[4].mxu0 %vm426_vm1, %v1528_v55  ;;  %v5234_v55 = vsel %vm788_vm3, %v1539_v24, %v5027_v39  ;;  %v5987_v24 = vld [vmem:[#allocation19_spill] sm:$0xff] }
  0x52   : > { %4076 = vmatprep.mubr.msk.f32.mxu1 %vm426_vm1, %v4877_v56  ;;  %4171 = vmatprep.mubr.msk.f32.mxu0 %vm426_vm1, %v5200_v61  ;;  %v1547_v35 = vrot.slane %v5987_v24, 2  ;;  %v1553_v60 = vsel %vm788_vm3, %v5035_v34, %v1552_v58 }
  0x55   : > { %4077 = vmatmul.mubr.msk.f32.gmra.mrb[12].mxu1 %vm426_vm1, %v5981_v32  ;;  %4172 = vmatmul.mubr.msk.f32.gmra.mrb[6].mxu0 %vm426_vm1, %v1533_v7  ;;  %v793_v7 = vsel %vm788_vm3, %v790_v21, %v792_v63  ;;  %v798_v21 = vsel %vm788_vm3, %v5109_v16, %v797_v31  ;;  %v1548_v63 = vsel %vm788_vm3, %v5030_v40, %v1547_v35 }
  0x56   : > { %4079 = vmatprep.mubr.msk.f32.mxu1 %vm426_vm1, %v5983_v44  ;;  %4174 = vmatprep.mubr.msk.f32.mxu0 %vm426_vm1, %v5215_v38 }
  0x59   : > { %4080 = vmatmul.mubr.msk.f32.gmra.mrb[14].mxu1 %vm426_vm1, %v5985_v43  ;;  %4175 = vmatmul.mubr.msk.f32.gmra.mrb[8].mxu0 %vm426_vm1, %v1538_v6  ;;  %v1549_v6 = vrot.slane %v4962_v47, 2 }
  0x5a   : > { %4084 = vmatprep.mubr.msk.f32.mxu1 %vm426_vm1, %v791_v14  ;;  %4177 = vmatprep.mubr.msk.f32.mxu0 %vm426_vm1, %v5234_v55  ;;  %v802_v14 = vrot.slane %v5988_v9, 2 }
  0x5c   : > { %v803_v16 = vsel %vm788_vm3, %v4968_v49, %v802_v14  ;;  %v5990_v49 = vld [vmem:[#allocation8_spill] sm:$0xff] }
  0x5d   : > { %4085 = vmatmul.mubr.msk.f32.vlgmr.msra.gmra.mrb[0].mxu1 %vm426_vm1, %v793_v7  ;;  %4178 = vmatmul.mubr.msk.f32.gmra.mrb[10].mxu0 %vm426_vm1, %v1543_v19  ;;  %v5266_v7 = vsel %vm788_vm3, %v1549_v6, %v5035_v34  ;;  %v812_v26 = vrot.slane %v5990_v49, 2  ;;  %v3785_v34 = vld [vmem:[%s5925_s1 + $0x20] sm:$0xf] }
  0x5e   : > { %4087 = vmatprep.mubr.msk.f32.mxu1 %vm426_vm1, %v1516_v5  ;;  %4180 = vmatprep.mubr.msk.f32.mxu0 %vm426_vm1, %v5250_v8  ;;  %v5989_v5 = vld [vmem:[#allocation6_spill] sm:$0xff] }
  0x5f   : > { %4317 = vmatpush3.msk.msra.mxu1 %vm459_vm0, %v4695_v0  ;;  %v807_v19 = vrot.slane %v5989_v5, 2 }
  0x61   : > { %4088 = vmatmul.mubr.msk.f32.gmra.mrb[2].mxu1 %vm426_vm1, %v798_v21  ;;  %4181 = vmatmul.mubr.msk.f32.gmra.mrb[12].mxu0 %vm426_vm1, %v1548_v63  ;;  %v808_v0 = vsel %vm788_vm3, %v4971_v50, %v807_v19  ;;  %v5991_v50 = vld [vmem:[#allocation10_spill] sm:$0xff] }
  0x62   : > { %4090 = vmatprep.mubr.msk.f32.mxu1 %vm426_vm1, %v5162_v41  ;;  %4183 = vmatprep.mubr.msk.f32.mxu0 %vm426_vm1, %v5266_v7  ;;  %v817_v31 = vrot.slane %v5991_v50, 2 }
  0x65   : > { %4091 = vmatmul.mubr.msk.f32.gmra.mrb[4].mxu1 %vm426_vm1, %v803_v16  ;;  %4184 = vmatmul.mubr.msk.f32.gmra.mrb[14].mxu0 %vm426_vm1, %v1553_v60 }
  0x66   : > { %4093 = vmatprep.mubr.msk.f32.mxu1 %vm426_vm1, %v5184_v30  ;;  %4188 = vmatprep.mubr.msk.f32.mxu0 %vm426_vm1, %v4740_v10  ;;  %v813_v10 = vsel %vm788_vm3, %v4988_v62, %v812_v26  ;;  %v5992_v62 = vld [vmem:[#allocation13_spill] sm:$0xff] }
  0x69   : > { %4094 = vmatmul.mubr.msk.f32.gmra.mrb[6].mxu1 %vm426_vm1, %v808_v0  ;;  %4189 = vmatmul.mubr.msk.f32.vlgmr.msra.gmra.mrb[0].mxu0 %vm426_vm1, %v4760_v17  ;;  %v818_v17 = vsel %vm788_vm3, %v5024_v52, %v817_v31 }
  0x6a   : > { %4213 = vmatpush3.msk.msra.mxu0 %vm459_vm0, %v5167_v53  ;;  %4096 = vmatprep.mubr.msk.f32.mxu1 %vm426_vm1, %v5200_v61  ;;  %v822_v53 = vrot.slane %v5992_v62, 2 }
  0x6b   : > { %4191 = vmatprep.mubr.msk.f32.mxu0 %vm426_vm1, %v4772_v23  ;;  %4238 = vmatprep.subr.msk.mxu0 %vm459_vm0, %v3785_v34 }
  0x6c   : > { %v823_v23 = vsel %vm788_vm3, %v5027_v39, %v822_v53 }
  0x6d   : > { %4097 = vmatmul.mubr.msk.f32.gmra.mrb[8].mxu1 %vm426_vm1, %v813_v10  ;;  %4192 = vmatmul.mubr.msk.f32.gmra.mrb[2].mxu0 %vm426_vm1, %v4795_v29  ;;  %v5993_v29 = vld [vmem:[#allocation16_spill] sm:$0xff] }
  0x6e   : > { %4099 = vmatprep.mubr.msk.f32.mxu1 %vm426_vm1, %v5215_v38  ;;  %4194 = vmatprep.mubr.msk.f32.mxu0 %vm426_vm1, %v4806_v33  ;;  %v827_v52 = vrot.slane %v5993_v29, 2 }
  0x70   : > { %v828_v33 = vsel %vm788_vm3, %v5030_v40, %v827_v52 }
  0x71   : > { %4100 = vmatmul.mubr.msk.f32.gmra.mrb[10].mxu1 %vm426_vm1, %v818_v17  ;;  %4195 = vmatmul.mubr.msk.f32.gmra.mrb[4].mxu0 %vm426_vm1, %v4827_v37  ;;  %v5994_v37 = vld [vmem:[#allocation20_spill] sm:$0xff] }
  0x72   : > { %4102 = vmatprep.mubr.msk.f32.mxu1 %vm426_vm1, %v5234_v55  ;;  %4197 = vmatprep.mubr.msk.f32.mxu0 %vm426_vm1, %v4846_v45 }
  0x75   : > { %4103 = vmatmul.mubr.msk.f32.gmra.mrb[12].mxu1 %vm426_vm1, %v823_v23  ;;  %4198 = vmatmul.mubr.msk.f32.gmra.mrb[6].mxu0 %vm426_vm1, %v4849_v46 }
  0x76   : > { %4105 = vmatprep.mubr.msk.f32.mxu1 %vm426_vm1, %v5250_v8  ;;  %4200 = vmatprep.mubr.msk.f32.mxu0 %vm426_vm1, %v4877_v56 }
  0x79   : > { %4106 = vmatmul.mubr.msk.f32.gmra.mrb[14].mxu1 %vm426_vm1, %v828_v33  ;;  %4201 = vmatmul.mubr.msk.f32.gmra.mrb[8].mxu0 %vm426_vm1, %v5981_v32 }
  0x7a   : > { %4122 = vmatprep.mubr.msk.f32.mxu1 %vm426_vm1, %v4846_v45  ;;  %4203 = vmatprep.mubr.msk.f32.mxu0 %vm426_vm1, %v5983_v44  ;;  %v5995_v45 = vld [vmem:[#allocation21_spill] sm:$0xff] }
  0x7d   : > { %4123 = vmatmul.mubr.msk.f32.vlgmr.msra.gmra.mrb[8].mxu1 %vm426_vm1, %v4849_v46  ;;  %4204 = vmatmul.mubr.msk.f32.gmra.mrb[10].mxu0 %vm426_vm1, %v5985_v43  ;;  %v5996_v46 = vld [vmem:[#allocation5_spill] sm:$0xff] }
  0x7e   : > { %4125 = vmatprep.mubr.msk.f32.mxu1 %vm426_vm1, %v4877_v56  ;;  %4206 = vmatprep.mubr.msk.f32.mxu0 %vm426_vm1, %v4962_v47  ;;  %v5997_v56 = vld [vmem:[#allocation7_spill] sm:$0xff] }
  0x81   : > { %4126 = vmatmul.mubr.msk.f32.gmra.mrb[10].mxu1 %vm426_vm1, %v5981_v32  ;;  %4207 = vmatmul.mubr.msk.f32.gmra.mrb[12].mxu0 %vm426_vm1, %v5994_v37 }
  0x82   : > { %4128 = vmatprep.mubr.msk.f32.mxu1 %vm426_vm1, %v5983_v44  ;;  %4209 = vmatprep.mubr.msk.f32.mxu0 %vm426_vm1, %v5995_v45 }
  0x85   : > { %4129 = vmatmul.mubr.msk.f32.gmra.mrb[12].mxu1 %vm426_vm1, %v5985_v43  ;;  %4210 = vmatmul.mubr.msk.f32.gmra.mrb[14].mxu0 %vm426_vm1, %v4995_v15  ;;  %v5998_v15 = vld [vmem:[#allocation9_spill] sm:$0xff] }
  0x86   : > { %4131 = vmatprep.mubr.msk.f32.mxu1 %vm426_vm1, %v4962_v47  ;;  %4214 = vmatprep.mubr.msk.f32.mxu0 %vm426_vm1, %v5996_v46  ;;  %v5999_v47 = vld [vmem:[#allocation12_spill] sm:$0xff] }
  0x89   : > { %4132 = vmatmul.mubr.msk.f32.gmra.mrb[14].mxu1 %vm426_vm1, %v5994_v37  ;;  %4215 = vmatmul.mubr.msk.f32.vlgmr.msra.gmra.mrb[0].mxu0 %vm426_vm1, %v5043_v11  ;;  %v6000_v11 = vld [vmem:[#allocation22_spill] sm:$0xff] }
  0x8a   : > { %4239 = vmatpush3.msk.msra.mxu0 %vm459_vm0, %v3785_v34  ;;  %4217 = vmatprep.mubr.msk.f32.mxu0 %vm426_vm1, %v5997_v56 }
  0x8d   : > { %4218 = vmatmul.mubr.msk.f32.gmra.mrb[2].mxu0 %vm426_vm1, %v5047_v48 }
  0x8e   : > { %4220 = vmatprep.mubr.msk.f32.mxu0 %vm426_vm1, %v5998_v15 }
  0x91   : > { %4221 = vmatmul.mubr.msk.f32.gmra.mrb[4].mxu0 %vm426_vm1, %v5058_v51 }
  0x92   : > { %4223 = vmatprep.mubr.msk.f32.mxu0 %vm426_vm1, %v5999_v47 }
  0x95   : > { %4224 = vmatmul.mubr.msk.f32.gmra.mrb[6].mxu0 %vm426_vm1, %v5062_v20 }
  0x96   : > { %4226 = vmatprep.mubr.msk.f32.mxu0 %vm426_vm1, %v4949_v27  ;;  %v2500_v27 = vld [vmem:[%s5927_s3] sm:$0xf] }
  0x97   : > { %4264 = vmatprep.subr.msk.mxu1 %vm459_vm0, %v2500_v27 }
  0x98   : > { %4265 = vmatpush3.msk.msra.mxu1 %vm459_vm0, %v2500_v27 }
  0x99   : > { %4227 = vmatmul.mubr.msk.f32.gmra.mrb[8].mxu0 %vm426_vm1, %v5066_v18 }
  0x9a   : > { %4229 = vmatprep.mubr.msk.f32.mxu0 %vm426_vm1, %v4992_v1 }
  0x9d   : > { %4230 = vmatmul.mubr.msk.f32.gmra.mrb[10].mxu0 %vm426_vm1, %v5070_v42 }
  0x9e   : > { %4232 = vmatprep.mubr.msk.f32.mxu0 %vm426_vm1, %v5115_v28 }
  0xa1   : > { %4233 = vmatmul.mubr.msk.f32.gmra.mrb[12].mxu0 %vm426_vm1, %v5074_v25 }
  0xa2   : > { %4235 = vmatprep.mubr.msk.f32.mxu0 %vm426_vm1, %v6000_v11 }
  0xa5   : > { %4236 = vmatmul.mubr.msk.f32.gmra.mrb[14].mxu0 %vm426_vm1, %v5077_v22 }
  0xa6   : > { %4240 = vmatprep.mubr.msk.f32.mxu0 %vm426_vm1, %v5162_v41 }
  0xa9   : > { %4241 = vmatmul.mubr.msk.f32.vlgmr.msra.gmra.mrb[0].mxu0 %vm426_vm1, %v5085_v2 }
  0xaa   : > { %4243 = vmatprep.mubr.msk.f32.mxu0 %vm426_vm1, %v5184_v30 }
  0xad   : > { %4244 = vmatmul.mubr.msk.f32.gmra.mrb[2].mxu0 %vm426_vm1, %v5089_v13 }
  0xae   : > { %4246 = vmatprep.mubr.msk.f32.mxu0 %vm426_vm1, %v5200_v61 }
  0xb1   : > { %4247 = vmatmul.mubr.msk.f32.gmra.mrb[4].mxu0 %vm426_vm1, %v5097_v54 }
  0xb2   : > { %4249 = vmatprep.mubr.msk.f32.mxu0 %vm426_vm1, %v5215_v38 }
  0xb5   : > { %4250 = vmatmul.mubr.msk.f32.gmra.mrb[6].mxu0 %vm426_vm1, %v5101_v3 }
  0xb6   : > { %4252 = vmatprep.mubr.msk.f32.mxu0 %vm426_vm1, %v5234_v55 }
  0xb9   : > { %4253 = vmatmul.mubr.msk.f32.gmra.mrb[8].mxu0 %vm426_vm1, %v5105_v12 }
  0xba   : > { %4255 = vmatprep.mubr.msk.f32.mxu0 %vm426_vm1, %v5250_v8 }
  0xbd   : > { %4256 = vmatmul.mubr.msk.f32.gmra.mrb[10].mxu0 %vm426_vm1, %v5121_v59 }
  0xbe   : > { %4258 = vmatprep.mubr.msk.f32.mxu0 %vm426_vm1, %v5266_v7 }
  0xc1   : > { %4259 = vmatmul.mubr.msk.f32.gmra.mrb[12].mxu0 %vm426_vm1, %v5127_v4 }
  0xc2   : > { %4261 = vmatprep.mubr.msk.f32.mxu0 %vm426_vm1, %v5133_v57  ;;  %v3803_v57 = vld [vmem:[%s5926_s2] ss:$0 sm:$0xff] }
  0xc5   : > { %4262 = vmatmul.mubr.msk.f32.gmra.mrb[14].mxu0 %vm426_vm1, %v5148_v36 }
 0x130   : > { %v4086_v48 = vpop.f32.mrb[0].mxu1 }
 0x131   : > { %v932_v1 = vpop.f32.mrb[1].mxu1 }
 0x134   : > { %v4089_v39 = vpop.f32.mrb[2].mxu1 }
 0x135   : > { %v942_v40 = vpop.f32.mrb[3].mxu1 }
 0x138   : > { %v4092_v51 = vpop.f32.mrb[4].mxu1 }
 0x139   : > { %v952_v20 = vpop.f32.mrb[5].mxu1 }
 0x13c   : > { %v4095_v18 = vpop.f32.mrb[6].mxu1 }
 0x13d   : > { %v962_v42 = vpop.f32.mrb[7].mxu1 }
 0x150   : > { %v4124_v25 = vpop.f32.mrb[8].mxu1 }
 0x151   : > { %v1213_v22 = vpop.f32.mrb[9].mxu1 }
 0x154   : > { %v4127_v2 = vpop.f32.mrb[10].mxu1 }
 0x155   : > { %v1223_v13 = vpop.f32.mrb[11].mxu1 }
 0x158   : > { %v4130_v54 = vpop.f32.mrb[12].mxu1 }
 0x159   : > { %v1233_v3 = vpop.f32.mrb[13].mxu1 }
 0x15c   : > { %v4133_v12 = vpop.f32.mrb[14].mxu1 }
 0x15d   : > { %v1243_v28 = vpop.f32.mrb[15].mxu1 }
 0x17c   : > { %v4242_v59 = vpop.f32.mrb[0].mxu0 }
 0x17d   : > { %v4318_v4 = vadd.f32 %v4242_v59, %v4086_v48  ;;  %v2382_v36 = vpop.f32.mrb[1].mxu0 }
 0x17e   : > { %v4319_v41 = vadd.f32 %v2382_v36, %v932_v1  ;;  %v3136_v1 = vld [vmem:[%s5929_s5] sm:$0xf] }
 0x17f   : > { %v2485_v38 = vadd.f32 %v4318_v4, %v3803_v57  ;;  %4290 = vmatprep.subr.msk.mxu1 %vm459_vm0, %v3136_v1 }
 0x180   : > { %v2484_v30 = vadd.f32 %v4319_v41, %v3803_v57  ;;  %v4245_v61 = vpop.f32.mrb[2].mxu0 }
 0x181   : > { %v4320_v32 = vadd.f32 %v4245_v61, %v4089_v39  ;;  %v2392_v44 = vpop.f32.mrb[3].mxu0  ;;  %v5463_v39 = vld [vmem:[%s5928_s4] ss:$0 sm:$0xff] }
 0x182   : > { %v4321_v55 = vadd.f32 %v2392_v44, %v942_v40  ;;  %4266 = vmatprep.mubr.msk.f32.mxu1 %vm426_vm1, %v2484_v30 }
 0x183   : > { %4267 = vmatmul.mubr.msk.f32.vlgmr.msra.gmra.mrb[16].mxu1 %vm426_vm1, %v2485_v38  ;;  %v2487_v35 = vadd.f32 %v4320_v32, %v3803_v57 }
 0x184   : > { %v2486_v43 = vadd.f32 %v4321_v55, %v3803_v57  ;;  %v4248_v24 = vpop.f32.mrb[4].mxu0  ;;  %4291 = vmatpush3.msk.msra.mxu1 %vm459_vm0, %v3136_v1 }
 0x185   : > { %v4322_v8 = vadd.f32 %v4248_v24, %v4092_v51  ;;  %v2402_v6 = vpop.f32.mrb[5].mxu0 }
 0x186   : > { %v4323_v21 = vadd.f32 %v2402_v6, %v952_v20  ;;  %4269 = vmatprep.mubr.msk.f32.mxu1 %vm426_vm1, %v2486_v43 }
 0x187   : > { %4270 = vmatmul.mubr.msk.f32.gmra.mrb[18].mxu1 %vm426_vm1, %v2487_v35  ;;  %v2489_v14 = vadd.f32 %v4322_v8, %v3803_v57 }
 0x188   : > { %v2488_v63 = vadd.f32 %v4323_v21, %v3803_v57  ;;  %v4251_v9 = vpop.f32.mrb[6].mxu0 }
 0x189   : > { %v4324_v58 = vadd.f32 %v4251_v9, %v4095_v18  ;;  %v2412_v7 = vpop.f32.mrb[7].mxu0 }
 0x18a   : > { %v4325_v16 = vadd.f32 %v2412_v7, %v962_v42  ;;  %4272 = vmatprep.mubr.msk.f32.mxu1 %vm426_vm1, %v2488_v63 }
 0x18b   : > { %4273 = vmatmul.mubr.msk.f32.gmra.mrb[20].mxu1 %vm426_vm1, %v2489_v14  ;;  %v2491_v19 = vadd.f32 %v4324_v58, %v3803_v57 }
 0x18c   : > { %v2490_v60 = vadd.f32 %v4325_v16, %v3803_v57  ;;  %v4254_v5 = vpop.f32.mrb[8].mxu0 }
 0x18d   : > { %v4326_v0 = vadd.f32 %v4254_v5, %v4124_v25  ;;  %v2422_v49 = vpop.f32.mrb[9].mxu0 }
 0x18e   : > { %v4327_v26 = vadd.f32 %v2422_v49, %v1213_v22  ;;  %4275 = vmatprep.mubr.msk.f32.mxu1 %vm426_vm1, %v2490_v60 }
 0x18f   : > { %4276 = vmatmul.mubr.msk.f32.gmra.mrb[22].mxu1 %vm426_vm1, %v2491_v19  ;;  %v2493_v50 = vadd.f32 %v4326_v0, %v3803_v57 }
 0x190   : > { %v2492_v34 = vadd.f32 %v4327_v26, %v3803_v57  ;;  %v4257_v10 = vpop.f32.mrb[10].mxu0 }
 0x191   : > { %v4328_v31 = vadd.f32 %v4257_v10, %v4127_v2  ;;  %v2432_v17 = vpop.f32.mrb[11].mxu0 }
 0x192   : > { %v4329_v62 = vadd.f32 %v2432_v17, %v1223_v13  ;;  %4278 = vmatprep.mubr.msk.f32.mxu1 %vm426_vm1, %v2492_v34 }
 0x193   : > { %4279 = vmatmul.mubr.msk.f32.gmra.mrb[24].mxu1 %vm426_vm1, %v2493_v50  ;;  %v2495_v29 = vadd.f32 %v4328_v31, %v3803_v57 }
 0x194   : > { %v2494_v53 = vadd.f32 %v4329_v62, %v3803_v57  ;;  %v4260_v23 = vpop.f32.mrb[12].mxu0 }
 0x195   : > { %v4330_v52 = vadd.f32 %v4260_v23, %v4130_v54  ;;  %v2442_v33 = vpop.f32.mrb[13].mxu0 }
 0x196   : > { %v4331_v37 = vadd.f32 %v2442_v33, %v1233_v3  ;;  %4281 = vmatprep.mubr.msk.f32.mxu1 %vm426_vm1, %v2494_v53 }
 0x197   : > { %4282 = vmatmul.mubr.msk.f32.gmra.mrb[26].mxu1 %vm426_vm1, %v2495_v29  ;;  %v2497_v56 = vadd.f32 %v4330_v52, %v3803_v57 }
 0x198   : > { %v2496_v45 = vadd.f32 %v4331_v37, %v3803_v57  ;;  %v4263_v46 = vpop.f32.mrb[14].mxu0 }
 0x199   : > { %v4332_v15 = vadd.f32 %v4263_v46, %v4133_v12  ;;  %v2452_v47 = vpop.f32.mrb[15].mxu0 }
 0x19a   : > { %v4333_v11 = vadd.f32 %v2452_v47, %v1243_v28  ;;  %4284 = vmatprep.mubr.msk.f32.mxu1 %vm426_vm1, %v2496_v45 }
 0x19b   : > { %4285 = vmatmul.mubr.msk.f32.gmra.mrb[28].mxu1 %vm426_vm1, %v2497_v56  ;;  %v2499_v48 = vadd.f32 %v4332_v15, %v3803_v57 }
 0x19c   : > { %v2498_v27 = vadd.f32 %v4333_v11, %v3803_v57 }
 0x19e   : > { %4287 = vmatprep.mubr.msk.f32.mxu1 %vm426_vm1, %v2498_v27 }
 0x19f   : > { %4288 = vmatmul.mubr.msk.f32.gmra.mrb[30].mxu1 %vm426_vm1, %v2499_v48 }
 0x256   : > { %v4268_v40 = vpop.f32.mrb[16].mxu1 }
 0x257   : > { %v2631_v51 = vadd.f32 %v4268_v40, %v5463_v39  ;;  %v2625_v20 = vpop.f32.mrb[17].mxu1 }
 0x258   : > { %v2626_v18 = vadd.f32 %v5463_v39, %v2625_v20 }
 0x259   : > { %v5467_v42 = vmul.f32 0.70710677, %v2631_v51  ;;  %v5493_v5 = vmul.f32 0.5, %v2631_v51 }
 0x25a   : > { %v5469_v25 = vmul.f32 0.70710677, %v2626_v18  ;;  %v4271_v22 = vpop.f32.mrb[18].mxu1  ;;  %v5504_v31 = vmul.f32 0.5, %v2626_v18 }
 0x25b   : > { %v2737_v2 = vand.u32 2147483647, %v5467_v42  ;;  %v5473_v13 = vadd.f32 %v4271_v22, %v5463_v39  ;;  %v2635_v54 = vpop.f32.mrb[19].mxu1  ;;  %vm3057_vm4 = vcmp.lt.f32.partialorder %v5467_v42, 0.0 }
 0x25c   : > { %v2736_v3 = vand.u32 2147483647, %v5469_v25  ;;  %v2636_v12 = vadd.f32 %v5463_v39, %v2635_v54  ;;  %vm3056_vm5 = vcmp.lt.f32.partialorder %v5469_v25, 0.0 }
 0x25d   : > { %v2753_v28 = vmul.f32 0.3275911, %v2737_v2  ;;  %v5478_v59 = vmul.f32 0.70710677, %v5473_v13  ;;  %v2961_v41 = vsub.f32 0.0, %v2737_v2 }
 0x25e   : > { %v2752_v4 = vmul.f32 0.3275911, %v2736_v3  ;;  %v5480_v57 = vmul.f32 0.70710677, %v2636_v12  ;;  %v4274_v61 = vpop.f32.mrb[20].mxu1  ;;  %v2960_v32 = vsub.f32 0.0, %v2736_v3 }
 0x25f   : > { %v2769_v36 = vadd.f32 1.0, %v2753_v28  ;;  %v2739_v30 = vand.u32 2147483647, %v5478_v59  ;;  %v2645_v55 = vpop.f32.mrb[21].mxu1  ;;  %v2977_v8 = vmul.f32 %v2961_v41, %v2737_v2  ;;  %v5485_v63 = vadd.f32 %v4274_v61, %v5463_v39 }
 0x260   : > { %v2768_v38 = vadd.f32 1.0, %v2752_v4  ;;  %v2738_v44 = vand.u32 2147483647, %v5480_v57  ;;  %v2976_v14 = vmul.f32 %v2960_v32, %v2736_v3  ;;  %v5488_v7 = vadd.f32 %v5463_v39, %v2645_v55 }
 0x261   : > { %4487 = vrcp.f32 %v2769_v36  ;;  %v2755_v43 = vmul.f32 0.3275911, %v2739_v30  ;;  %v2963_v21 = vsub.f32 0.0, %v2739_v30  ;;  %v5491_v60 = vmul.f32 0.70710677, %v5485_v63 }
 0x262   : > { %4489 = vrcp.f32 %v2768_v38  ;;  %v2754_v24 = vmul.f32 0.3275911, %v2738_v44  ;;  %v4277_v35 = vpop.f32.mrb[22].mxu1  ;;  %v2962_v16 = vsub.f32 0.0, %v2738_v44  ;;  %v5496_v19 = vmul.f32 0.70710677, %v5488_v7 }
 0x263   : > { %v2771_v6 = vadd.f32 1.0, %v2755_v43  ;;  %v2655_v9 = vpop.f32.mrb[23].mxu1  ;;  %v2994_v49 = vmul.f32 1.442695, %v2977_v8  ;;  %v2979_v26 = vmul.f32 %v2963_v21, %v2739_v30  ;;  %v2741_v34 = vand.u32 2147483647, %v5491_v60 }
 0x264   : > { %v2770_v58 = vadd.f32 1.0, %v2754_v24  ;;  %v5500_v10 = vadd.f32 %v4277_v35, %v5463_v39  ;;  %v2992_v17 = vmul.f32 1.442695, %v2976_v14  ;;  %v2740_v62 = vand.u32 2147483647, %v5496_v19 }
 0x265   : > { %4491 = vrcp.f32 %v2771_v6  ;;  %v5508_v53 = vadd.f32 %v5463_v39, %v2655_v9  ;;  %v2978_v23 = vmul.f32 %v2962_v16, %v2738_v44  ;;  %v2757_v29 = vmul.f32 0.3275911, %v2741_v34 }
 0x266   : > { %4493 = vrcp.f32 %v2770_v58  ;;  %v4280_v0 = vpop.f32.mrb[24].mxu1  ;;  %v2965_v52 = vsub.f32 0.0, %v2741_v34  ;;  %v5511_v33 = vmul.f32 0.70710677, %v5500_v10  ;;  %v5513_v37 = vmul.f32 0.5, %v2636_v12 }
 0x267   : > { %v5502_v50 = vpop.f32.mrb[25].mxu1  ;;  %v2756_v45 = vmul.f32 0.3275911, %v2740_v62  ;;  %v2964_v46 = vsub.f32 0.0, %v2740_v62  ;;  %v5516_v56 = vmul.f32 0.70710677, %v5508_v53  ;;  %4495 = vpow2.f32 %v2994_v49 }
 0x268   : > { %v2998_v47 = vmul.f32 1.442695, %v2979_v26  ;;  %v2773_v11 = vadd.f32 1.0, %v2757_v29  ;;  %v2743_v27 = vand.u32 2147483647, %v5511_v33  ;;  %v2981_v51 = vmul.f32 %v2965_v52, %v2741_v34 }
 0x269   : > { %v2772_v20 = vadd.f32 1.0, %v2756_v45  ;;  %v2742_v18 = vand.u32 2147483647, %v5516_v56  ;;  %v2996_v54 = vmul.f32 1.442695, %v2978_v23  ;;  %v2980_v28 = vmul.f32 %v2964_v46, %v2740_v62 }
 0x26a   : > { %v5521_v48 = vpop.f32.mrb[26].mxu1  ;;  %4497 = vrcp.f32 %v2773_v11  ;;  %v2759_v3 = vmul.f32 0.3275911, %v2743_v27  ;;  %v2967_v4 = vsub.f32 0.0, %v2743_v27  ;;  %v3002_v24 = vmul.f32 1.442695, %v2981_v51 }
 0x26b   : > { %v5518_v15 = vpop.eup %4487  ;;  %v5527_v22 = vpop.f32.mrb[27].mxu1  ;;  %4499 = vrcp.f32 %v2772_v20  ;;  %v2758_v38 = vmul.f32 0.3275911, %v2742_v18  ;;  %v3000_v58 = vmul.f32 1.442695, %v2980_v28  ;;  %v5543_v16 = vadd.f32 %v4280_v0, %v5463_v39 }
 0x26c   : > { %v5523_v1 = vpop.eup %4489  ;;  %v2817_v40 = vmul.f32 1.0614054, %v5518_v15  ;;  %4501 = vpow2.f32 %v2992_v17  ;;  %v2775_v61 = vadd.f32 1.0, %v2759_v3  ;;  %v2983_v35 = vmul.f32 %v2967_v4, %v2743_v27 }
 0x26d   : > { %v2816_v2 = vmul.f32 1.0614054, %v5523_v1  ;;  %v2774_v21 = vadd.f32 1.0, %v2758_v38  ;;  %v2966_v34 = vsub.f32 0.0, %v2742_v18  ;;  %v5554_v51 = vmul.f32 0.70710677, %v5543_v16 }
 0x26e   : > { %v2833_v12 = vadd.f32 -1.4531521, %v2817_v40  ;;  %v5530_v36 = vpop.f32.mrb[28].mxu1  ;;  %4503 = vrcp.f32 %v2775_v61  ;;  %v3006_v29 = vmul.f32 1.442695, %v2983_v35  ;;  %vm3059_vm6 = vcmp.lt.f32.partialorder %v5478_v59, 0.0 }
 0x26f   : > { %v5532_v41 = vpop.eup %4491  ;;  %v2832_v30 = vadd.f32 -1.4531521, %v2816_v2  ;;  %v5534_v32 = vpop.f32.mrb[29].mxu1  ;;  %4505 = vrcp.f32 %v2774_v21  ;;  %v2982_v11 = vmul.f32 %v2966_v34, %v2742_v18  ;;  %vm3058_vm7 = vcmp.lt.f32.partialorder %v5480_v57, 0.0 }
 0x270   : > { %v5536_v44 = vpop.eup %4493  ;;  %v2849_v55 = vmul.f32 %v5518_v15, %v2833_v12  ;;  %v2819_v43 = vmul.f32 1.0614054, %v5532_v41  ;;  %4507 = vpow2.f32 %v2998_v47  ;;  %v2707_v59 = vmul.f32 0.5, %v5473_v13 }
 0x271   : > { %v2848_v8 = vmul.f32 %v5523_v1, %v2832_v30  ;;  %v2818_v6 = vmul.f32 1.0614054, %v5536_v44  ;;  %v4496_v45 = vpop.eup %4495  ;;  %4509 = vpow2.f32 %v2996_v54  ;;  %v3004_v3 = vmul.f32 1.442695, %v2982_v11 }
 0x272   : > { %v2865_v9 = vadd.f32 1.4214138, %v2849_v55  ;;  %v2835_v14 = vadd.f32 -1.4531521, %v2819_v43  ;;  %v5545_v17 = vpop.f32.mrb[30].mxu1  ;;  %4511 = vpow2.f32 %v3002_v24  ;;  %vm3061_vm8 = vcmp.lt.f32.partialorder %v5491_v60, 0.0 }
 0x273   : > { %v2864_v49 = vadd.f32 1.4214138, %v2848_v8  ;;  %v2834_v26 = vadd.f32 -1.4531521, %v2818_v6  ;;  %v5549_v52 = vpop.f32.mrb[31].mxu1  ;;  %4513 = vpow2.f32 %v3000_v58  ;;  %v5571_v8 = vadd.f32 %v5463_v39, %v5502_v50 }
 0x274   : > { %v2881_v62 = vmul.f32 %v5518_v15, %v2865_v9  ;;  %v2851_v23 = vmul.f32 %v5532_v41, %v2835_v14  ;;  %v5556_v20 = vpop.eup %4497  ;;  %4515 = vpow2.f32 %v3006_v29  ;;  %v5567_v55 = vand.u32 2147483647, %v5554_v51 }
 0x275   : > { %v2880_v46 = vmul.f32 %v5523_v1, %v2864_v49  ;;  %v2850_v0 = vmul.f32 %v5536_v44, %v2834_v26  ;;  %v5558_v12 = vpop.eup %4499  ;;  %v2821_v18 = vmul.f32 1.0614054, %v5556_v20  ;;  %4517 = vpow2.f32 %v3004_v3 }
 0x276   : > { %v2897_v27 = vadd.f32 -0.28449672, %v2881_v62  ;;  %v2867_v40 = vadd.f32 1.4214138, %v2851_v23  ;;  %v4502_v54 = vpop.eup %4501  ;;  %v2820_v38 = vmul.f32 1.0614054, %v5558_v12  ;;  %v5635_v60 = vadd.f32 %v5463_v39, %v5527_v22 }
 0x277   : > { %v2896_v2 = vadd.f32 -0.28449672, %v2880_v46  ;;  %v2866_v47 = vadd.f32 1.4214138, %v2850_v0  ;;  %v2837_v35 = vadd.f32 -1.4531521, %v2821_v18 }
 0x278   : > { %v2913_v28 = vmul.f32 %v5518_v15, %v2897_v27  ;;  %v2883_v4 = vmul.f32 %v5532_v41, %v2867_v40  ;;  %v5573_v6 = vpop.eup %4503  ;;  %v2836_v14 = vadd.f32 -1.4531521, %v2820_v38  ;;  %v2761_v46 = vmul.f32 0.3275911, %v5567_v55 }
 0x279   : > { %v2912_v30 = vmul.f32 %v5523_v1, %v2896_v2  ;;  %v2882_v61 = vmul.f32 %v5536_v44, %v2866_v47  ;;  %v2853_v26 = vmul.f32 %v5556_v20, %v2837_v35  ;;  %v2823_v34 = vmul.f32 1.0614054, %v5573_v6  ;;  %v5581_v50 = vpop.eup %4505 }
 0x27a   : > { %v2929_v43 = vadd.f32 0.2548296, %v2913_v28  ;;  %v2899_v24 = vadd.f32 -0.28449672, %v2883_v4  ;;  %v2852_v29 = vmul.f32 %v5558_v12, %v2836_v14  ;;  %v4508_v0 = vpop.eup %4507  ;;  %v2822_v4 = vmul.f32 1.0614054, %v5581_v50 }
 0x27b   : > { %v2928_v21 = vadd.f32 0.2548296, %v2912_v30  ;;  %v2898_v9 = vadd.f32 -0.28449672, %v2882_v61  ;;  %v2869_v27 = vadd.f32 1.4214138, %v2853_v26  ;;  %v4510_v2 = vpop.eup %4509 }
 0x27c   : > { %v2945_v58 = vmul.f32 %v5518_v15, %v2929_v43  ;;  %v2915_v49 = vmul.f32 %v5532_v41, %v2899_v24  ;;  %v2839_v40 = vadd.f32 -1.4531521, %v2823_v34  ;;  %v2868_v28 = vadd.f32 1.4214138, %v2852_v29 }
 0x27d   : > { %v2944_v62 = vmul.f32 %v5523_v1, %v2928_v21  ;;  %v2914_v23 = vmul.f32 %v5536_v44, %v2898_v9  ;;  %v4512_v1 = vpop.eup %4511  ;;  %v2885_v61 = vmul.f32 %v5556_v20, %v2869_v27  ;;  %v2838_v35 = vadd.f32 -1.4531521, %v2822_v4 }
 0x27e   : > { %v3025_v15 = vmul.f32 %v4496_v45, %v2945_v58  ;;  %v2931_v11 = vadd.f32 0.2548296, %v2915_v49  ;;  %v2855_v45 = vmul.f32 %v5573_v6, %v2839_v40  ;;  %v4514_v38 = vpop.eup %4513  ;;  %v2884_v24 = vmul.f32 %v5558_v12, %v2868_v28 }
 0x27f   : > { %v3024_v47 = vmul.f32 %v4502_v54, %v2944_v62  ;;  %v2930_v3 = vadd.f32 0.2548296, %v2914_v23  ;;  %v4516_v21 = vpop.eup %4515  ;;  %v2901_v58 = vadd.f32 -0.28449672, %v2885_v61  ;;  %v2854_v62 = vmul.f32 %v5581_v50, %v2838_v35 }
 0x280   : > { %v3041_v18 = vsub.f32 1.0, %v3025_v15  ;;  %v2947_v30 = vmul.f32 %v5532_v41, %v2931_v11  ;;  %v2871_v49 = vadd.f32 1.4214138, %v2855_v45  ;;  %v2900_v34 = vadd.f32 -0.28449672, %v2884_v24  ;;  %v4518_v11 = vpop.eup %4517 }
 0x281   : > { %v3040_v43 = vsub.f32 1.0, %v3024_v47  ;;  %v2946_v54 = vmul.f32 %v5536_v44, %v2930_v3  ;;  %v2917_v15 = vmul.f32 %v5556_v20, %v2901_v58  ;;  %v2870_v61 = vadd.f32 1.4214138, %v2854_v62 }
 0x282   : > { %v3073_v9 = vsub.f32 0.0, %v3041_v18  ;;  %v3027_v14 = vmul.f32 %v4508_v0, %v2947_v30  ;;  %v2887_v44 = vmul.f32 %v5573_v6, %v2871_v49  ;;  %v2916_v47 = vmul.f32 %v5558_v12, %v2900_v34 }
 0x283   : > { %v3072_v26 = vsub.f32 0.0, %v3040_v43  ;;  %v3026_v41 = vmul.f32 %v4510_v2, %v2946_v54  ;;  %v2933_v28 = vadd.f32 0.2548296, %v2917_v15  ;;  %v5621_v13 = vmul.f32 0.70710677, %v5571_v8 }
 0x284   : > { %v3089_v23 = vsel %vm3057_vm4, %v3073_v9, %v3041_v18  ;;  %v3043_v29 = vsub.f32 1.0, %v3027_v14  ;;  %v2903_v4 = vadd.f32 -0.28449672, %v2887_v44  ;;  %v2932_v30 = vadd.f32 0.2548296, %v2916_v47 }
 0x285   : > { %v3105_v27 = vadd.f32 1.0, %v3089_v23  ;;  %v3088_v0 = vsel %vm3056_vm5, %v3072_v26, %v3040_v43  ;;  %v3042_v40 = vsub.f32 1.0, %v3026_v41  ;;  %v2949_v25 = vmul.f32 %v5556_v20, %v2933_v28 }
 0x286   : > { %v3104_v2 = vadd.f32 1.0, %v3088_v0  ;;  %v3075_v3 = vsub.f32 0.0, %v3043_v29  ;;  %v2919_v43 = vmul.f32 %v5573_v6, %v2903_v4  ;;  %v2948_v9 = vmul.f32 %v5558_v12, %v2932_v30 }
 0x287   : > { %v3121_v42 = vmul.f32 %v3105_v27, %v5493_v5  ;;  %v3074_v18 = vsub.f32 0.0, %v3042_v40  ;;  %v2886_v5 = vmul.f32 %v5581_v50, %v2870_v61  ;;  %v3029_v58 = vmul.f32 %v4512_v1, %v2949_v25 }
 0x288   : > { %v3120_v45 = vmul.f32 %v3104_v2, %v5504_v31  ;;  %v3091_v54 = vsel %vm3059_vm6, %v3075_v3, %v3043_v29  ;;  %v2935_v49 = vadd.f32 0.2548296, %v2919_v43  ;;  %v2777_v26 = vadd.f32 1.0, %v2761_v46 }
 0x289   : > { %v3107_v24 = vadd.f32 1.0, %v3091_v54  ;;  %v3090_v35 = vsel %vm3058_vm7, %v3074_v18, %v3042_v40  ;;  %v3028_v31 = vmul.f32 %v4514_v38, %v2948_v9  ;;  %v2902_v20 = vadd.f32 -0.28449672, %v2886_v5 }
 0x28a   : > { %v3106_v14 = vadd.f32 1.0, %v3090_v35  ;;  %4292 = vmatprep.mubr.msk.f32.mxu1 %vm426_vm1, %v3120_v45  ;;  %v3045_v57 = vsub.f32 1.0, %v3029_v58  ;;  %v2951_v34 = vmul.f32 %v5573_v6, %v2935_v49  ;;  %4519 = vrcp.f32 %v2777_v26 }
 0x28b   : > { %4293 = vmatmul.mubr.msk.f32.vlgmr.msra.gmra.mrb[32].mxu1 %vm426_vm1, %v3121_v42  ;;  %v3123_v12 = vmul.f32 %v3107_v24, %v2707_v59  ;;  %v3044_v62 = vsub.f32 1.0, %v3028_v31  ;;  %v2918_v1 = vmul.f32 %v5581_v50, %v2902_v20  ;;  %v2708_v46 = vmul.f32 0.5, %v5488_v7 }
 0x28c   : > { %v3122_v41 = vmul.f32 %v3106_v14, %v5513_v37  ;;  %v3077_v23 = vsub.f32 0.0, %v3045_v57  ;;  %v3031_v29 = vmul.f32 %v4516_v21, %v2951_v34  ;;  %v5627_v6 = vadd.f32 %v5521_v48, %v5463_v39 }
 0x28d   : > { %v3076_v37 = vsub.f32 0.0, %v3044_v62  ;;  %v2934_v38 = vadd.f32 0.2548296, %v2918_v1  ;;  %vm3060_vm9 = vcmp.lt.f32.partialorder %v5496_v19, 0.0  ;;  %v2744_v21 = vand.u32 2147483647, %v5621_v13 }
 0x28e   : > { %4295 = vmatprep.mubr.msk.f32.mxu1 %vm426_vm1, %v3122_v41  ;;  %v3093_v15 = vsel %vm3061_vm8, %v3077_v23, %v3045_v57  ;;  %v3047_v7 = vsub.f32 1.0, %v3031_v29  ;;  %v2969_v48 = vsub.f32 0.0, %v5567_v55  ;;  %v2709_v3 = vmul.f32 0.5, %v5485_v63 }
 0x28f   : > { %4296 = vmatmul.mubr.msk.f32.gmra.mrb[34].mxu1 %vm426_vm1, %v3123_v12  ;;  %v3109_v44 = vadd.f32 1.0, %v3093_v15  ;;  %v3092_v27 = vsel %vm3060_vm9, %v3076_v37, %v3044_v62  ;;  %v2950_v0 = vmul.f32 %v5581_v50, %v2934_v38  ;;  %v2760_v2 = vmul.f32 0.3275911, %v2744_v21 }
 0x290   : > { %v3108_v40 = vadd.f32 1.0, %v3092_v27  ;;  %v3079_v47 = vsub.f32 0.0, %v3047_v7  ;;  %v5640_v19 = vmul.f32 0.70710677, %v5627_v6  ;;  %vm3063_vm10 = vcmp.lt.f32.partialorder %v5511_v33, 0.0 }
 0x291   : > { %v3030_v28 = vmul.f32 %v4518_v11, %v2950_v0  ;;  %v2776_v42 = vadd.f32 1.0, %v2760_v2  ;;  %v5645_v50 = vadd.f32 %v5530_v36, %v5463_v39  ;;  %v3125_v22 = vmul.f32 %v3109_v44, %v2709_v3 }
 0x292   : > { %v3124_v4 = vmul.f32 %v3108_v40, %v2708_v46  ;;  %v3095_v18 = vsel %vm3063_vm10, %v3079_v47, %v3047_v7  ;;  %v2747_v61 = vand.u32 2147483647, %v5640_v19  ;;  %v2985_v63 = vmul.f32 %v2969_v48, %v5567_v55 }
 0x293   : > { %v3046_v30 = vsub.f32 1.0, %v3030_v28  ;;  %4521 = vrcp.f32 %v2776_v42  ;;  %v5652_v11 = vmul.f32 0.70710677, %v5635_v60  ;;  %v2711_v33 = vmul.f32 0.5, %v5500_v10 }
 0x294   : > { %v5648_v45 = vpop.eup %4519  ;;  %4298 = vmatprep.mubr.msk.f32.mxu1 %vm426_vm1, %v3124_v4  ;;  %v2763_v25 = vmul.f32 0.3275911, %v2747_v61  ;;  %v3111_v43 = vadd.f32 1.0, %v3095_v18  ;;  %vm3062_vm11 = vcmp.lt.f32.partialorder %v5516_v56, 0.0  ;;  %v2968_v24 = vsub.f32 0.0, %v2744_v21 }
 0x295   : > { %v3078_v54 = vsub.f32 0.0, %v3046_v30  ;;  %v2825_v36 = vmul.f32 1.0614054, %v5648_v45  ;;  %4299 = vmatmul.mubr.msk.f32.gmra.mrb[36].mxu1 %vm426_vm1, %v3125_v22  ;;  %v5660_v55 = vand.u32 2147483647, %v5652_v11  ;;  %v2710_v10 = vmul.f32 0.5, %v5508_v53 }
 0x296   : > { %v2779_v5 = vadd.f32 1.0, %v2763_v25  ;;  %v5663_v14 = vmul.f32 0.70710677, %v5645_v50  ;;  %v3010_v49 = vmul.f32 1.442695, %v2985_v63  ;;  %v3127_v31 = vmul.f32 %v3111_v43, %v2711_v33 }
 0x297   : > { %v3094_v35 = vsel %vm3062_vm11, %v3078_v54, %v3046_v30  ;;  %v2841_v9 = vadd.f32 -1.4531521, %v2825_v36  ;;  %v2762_v26 = vmul.f32 0.3275911, %v5660_v55  ;;  %v2984_v41 = vmul.f32 %v2968_v24, %v2744_v21 }
 0x298   : > { %v3110_v58 = vadd.f32 1.0, %v3094_v35  ;;  %4523 = vrcp.f32 %v2779_v5  ;;  %v2749_v56 = vand.u32 2147483647, %v5663_v14  ;;  %v2971_v12 = vsub.f32 0.0, %v2747_v61 }
 0x299   : > { %v2857_v59 = vmul.f32 %v5648_v45, %v2841_v9  ;;  %v2778_v57 = vadd.f32 1.0, %v2762_v26  ;;  %v5671_v1 = vadd.f32 %v5463_v39, %v5534_v32  ;;  %4525 = vpow2.f32 %v3010_v49 }
 0x29a   : > { %v3126_v20 = vmul.f32 %v3110_v58, %v2710_v10  ;;  %v2765_v62 = vmul.f32 0.3275911, %v2749_v56  ;;  %v5675_v53 = vadd.f32 %v5545_v17, %v5463_v39  ;;  %v5681_v29 = vadd.f32 %v5463_v39, %v5549_v52 }
 0x29b   : > { %v2873_v34 = vadd.f32 1.4214138, %v2857_v59  ;;  %4527 = vrcp.f32 %v2778_v57  ;;  %v3008_v32 = vmul.f32 1.442695, %v2984_v41  ;;  %v5687_v38 = vmul.f32 0.70710677, %v5671_v1 }
 0x29c   : > { %4301 = vmatprep.mubr.msk.f32.mxu1 %vm426_vm1, %v3126_v20  ;;  %v2781_v46 = vadd.f32 1.0, %v2765_v62  ;;  %v2987_v7 = vmul.f32 %v2971_v12, %v2747_v61  ;;  %v5692_v44 = vmul.f32 0.70710677, %v5675_v53  ;;  %v5696_v27 = vmul.f32 0.70710677, %v5681_v29 }
 0x29d   : > { %v2889_v23 = vmul.f32 %v5648_v45, %v2873_v34  ;;  %4302 = vmatmul.mubr.msk.f32.gmra.mrb[38].mxu1 %vm426_vm1, %v3127_v31  ;;  %v5684_v37 = vpop.eup %4521  ;;  %v2748_v21 = vand.u32 2147483647, %v5687_v38  ;;  %v2970_v0 = vsub.f32 0.0, %v5660_v55  ;;  %v2973_v22 = vsub.f32 0.0, %v2749_v56 }
 0x29e   : > { %v2824_v15 = vmul.f32 1.0614054, %v5684_v37  ;;  %4529 = vrcp.f32 %v2781_v46  ;;  %v2751_v47 = vand.u32 2147483647, %v5692_v44  ;;  %v3014_v28 = vmul.f32 1.442695, %v2987_v7 }
 0x29f   : > { %v2905_v17 = vadd.f32 -0.28449672, %v2889_v23  ;;  %4531 = vpow2.f32 %v3008_v32  ;;  %v2764_v40 = vmul.f32 0.3275911, %v2748_v21  ;;  %v2750_v4 = vand.u32 2147483647, %v5696_v27 }
 0x2a0   : > { %v2840_v52 = vadd.f32 -1.4531521, %v2824_v15  ;;  %v2767_v30 = vmul.f32 0.3275911, %v2751_v47  ;;  %v2972_v33 = vsub.f32 0.0, %v2748_v21  ;;  %v2986_v5 = vmul.f32 %v2970_v0, %v5660_v55 }
 0x2a1   : > { %v2921_v39 = vmul.f32 %v5648_v45, %v2905_v17  ;;  %v2780_v18 = vadd.f32 1.0, %v2764_v40  ;;  %v2766_v54 = vmul.f32 0.3275911, %v2750_v4  ;;  %v5711_v58 = vmul.f32 0.5, %v5543_v16 }
 0x2a2   : > { %v5700_v48 = vpop.eup %4523  ;;  %v2856_v3 = vmul.f32 %v5684_v37, %v2840_v52  ;;  %v2783_v43 = vadd.f32 1.0, %v2767_v30  ;;  %v2989_v31 = vmul.f32 %v2973_v22, %v2749_v56  ;;  %v2988_v20 = vmul.f32 %v2972_v33, %v2748_v21 }
 0x2a3   : > { %v2937_v2 = vadd.f32 0.2548296, %v2921_v39  ;;  %v2827_v42 = vmul.f32 1.0614054, %v5700_v48  ;;  %v4526_v36 = vpop.eup %4525  ;;  %4533 = vrcp.f32 %v2780_v18  ;;  %v2782_v10 = vadd.f32 1.0, %v2766_v54 }
 0x2a4   : > { %v2872_v63 = vadd.f32 1.4214138, %v2856_v3  ;;  %4535 = vpow2.f32 %v3014_v28  ;;  %v3012_v12 = vmul.f32 1.442695, %v2986_v5  ;;  %v2975_v62 = vsub.f32 0.0, %v2751_v47 }
 0x2a5   : > { %v2953_v61 = vmul.f32 %v5648_v45, %v2937_v2  ;;  %v2843_v25 = vadd.f32 -1.4531521, %v2827_v42  ;;  %v5706_v24 = vpop.eup %4527  ;;  %4537 = vrcp.f32 %v2783_v43  ;;  %vm3065_vm12 = vcmp.lt.f32.partialorder %v5554_v51, 0.0 }
 0x2a6   : > { %v2888_v9 = vmul.f32 %v5684_v37, %v2872_v63  ;;  %v2826_v49 = vmul.f32 1.0614054, %v5706_v24  ;;  %4539 = vrcp.f32 %v2782_v10  ;;  %v2712_v17 = vmul.f32 0.5, %v5571_v8 }
 0x2a7   : > { %v3033_v35 = vmul.f32 %v4526_v36, %v2953_v61  ;;  %v2859_v45 = vmul.f32 %v5700_v48, %v2843_v25  ;;  %v3018_v7 = vmul.f32 1.442695, %v2989_v31  ;;  %v2974_v21 = vsub.f32 0.0, %v2750_v4 }
 0x2a8   : > { %v5715_v26 = vpop.eup %4529  ;;  %v2904_v59 = vadd.f32 -0.28449672, %v2888_v9  ;;  %v2842_v57 = vadd.f32 -1.4531521, %v2826_v49  ;;  %v3016_v40 = vmul.f32 1.442695, %v2988_v20  ;;  %4541 = vpow2.f32 %v3012_v12 }
 0x2a9   : > { %v2875_v41 = vadd.f32 1.4214138, %v2859_v45  ;;  %v2829_v34 = vmul.f32 1.0614054, %v5715_v26  ;;  %v3049_v55 = vsub.f32 1.0, %v3033_v35  ;;  %v4532_v23 = vpop.eup %4531  ;;  %v2991_v28 = vmul.f32 %v2975_v62, %v2751_v47 }
 0x2aa   : > { %v2920_v16 = vmul.f32 %v5684_v37, %v2904_v59  ;;  %v2858_v32 = vmul.f32 %v5706_v24, %v2842_v57  ;;  %vm3064_vm13 = vcmp.lt.f32.partialorder %v5621_v13, 0.0  ;;  %4543 = vpow2.f32 %v3018_v7 }
 0x2ab   : > { %v2891_v46 = vmul.f32 %v5700_v48, %v2875_v41  ;;  %v2845_v56 = vadd.f32 -1.4531521, %v2829_v34  ;;  %v3081_v2 = vsub.f32 0.0, %v3049_v55  ;;  %v2990_v63 = vmul.f32 %v2974_v21, %v2750_v4 }
 0x2ac   : > { %v2936_v15 = vadd.f32 0.2548296, %v2920_v16  ;;  %v2874_v52 = vadd.f32 1.4214138, %v2858_v32  ;;  %4545 = vpow2.f32 %v3016_v40  ;;  %v3022_v9 = vmul.f32 1.442695, %v2991_v28 }
 0x2ad   : > { %v2907_v39 = vadd.f32 -0.28449672, %v2891_v46  ;;  %v2861_v0 = vmul.f32 %v5715_v26, %v2845_v56  ;;  %v5725_v42 = vpop.eup %4533  ;;  %v3097_v25 = vsel %vm3065_vm12, %v3081_v2, %v3049_v55  ;;  %v3020_v41 = vmul.f32 1.442695, %v2990_v63 }
 0x2ae   : > { %v2952_v3 = vmul.f32 %v5684_v37, %v2936_v15  ;;  %v2890_v8 = vmul.f32 %v5706_v24, %v2874_v52  ;;  %v2828_v61 = vmul.f32 1.0614054, %v5725_v42  ;;  %v4536_v33 = vpop.eup %4535  ;;  %v3113_v16 = vadd.f32 1.0, %v3097_v25 }
 0x2af   : > { %v2923_v22 = vmul.f32 %v5700_v48, %v2907_v39  ;;  %v2877_v18 = vadd.f32 1.4214138, %v2861_v0  ;;  %v5732_v47 = vpop.eup %4537  ;;  %4547 = vpow2.f32 %v3022_v9  ;;  %vm3067_vm14 = vcmp.lt.f32.partialorder %v5640_v19, 0.0 }
 0x2b0   : > { %v3032_v30 = vmul.f32 %v4532_v23, %v2952_v3  ;;  %v2906_v36 = vadd.f32 -0.28449672, %v2890_v8  ;;  %v2844_v35 = vadd.f32 -1.4531521, %v2828_v61  ;;  %v5736_v5 = vpop.eup %4539  ;;  %v2831_v49 = vmul.f32 1.0614054, %v5732_v47 }
 0x2b1   : > { %v2939_v54 = vadd.f32 0.2548296, %v2923_v22  ;;  %v2893_v37 = vmul.f32 %v5715_v26, %v2877_v18  ;;  %v2830_v20 = vmul.f32 1.0614054, %v5736_v5  ;;  %v3129_v3 = vmul.f32 %v3113_v16, %v5711_v58 }
 0x2b2   : > { %v3048_v43 = vsub.f32 1.0, %v3032_v30  ;;  %v2922_v4 = vmul.f32 %v5706_v24, %v2906_v36  ;;  %v2860_v31 = vmul.f32 %v5725_v42, %v2844_v35  ;;  %v2847_v55 = vadd.f32 -1.4531521, %v2831_v49  ;;  %v4542_v15 = vpop.eup %4541 }
 0x2b3   : > { %v2955_v10 = vmul.f32 %v5700_v48, %v2939_v54  ;;  %v2909_v45 = vadd.f32 -0.28449672, %v2893_v37  ;;  %v2846_v62 = vadd.f32 -1.4531521, %v2830_v20  ;;  %4549 = vpow2.f32 %v3020_v41 }
 0x2b4   : > { %v3080_v59 = vsub.f32 0.0, %v3048_v43  ;;  %v2938_v57 = vadd.f32 0.2548296, %v2922_v4  ;;  %v2876_v12 = vadd.f32 1.4214138, %v2860_v31  ;;  %v2863_v21 = vmul.f32 %v5732_v47, %v2847_v55  ;;  %v4544_v2 = vpop.eup %4543 }
 0x2b5   : > { %v3035_v51 = vmul.f32 %v4536_v33, %v2955_v10  ;;  %v2925_v34 = vmul.f32 %v5715_v26, %v2909_v45  ;;  %v2862_v39 = vmul.f32 %v5736_v5, %v2846_v62  ;;  %vm3066_vm15 = vcmp.lt.f32.partialorder %v5652_v11, 0.0 }
 0x2b6   : > { %v3096_v48 = vsel %vm3064_vm13, %v3080_v59, %v3048_v43  ;;  %v2954_v32 = vmul.f32 %v5706_v24, %v2938_v57  ;;  %v2892_v7 = vmul.f32 %v5725_v42, %v2876_v12  ;;  %v2879_v22 = vadd.f32 1.4214138, %v2863_v21  ;;  %v4546_v8 = vpop.eup %4545 }
 0x2b7   : > { %v3112_v23 = vadd.f32 1.0, %v3096_v48  ;;  %v3051_v46 = vsub.f32 1.0, %v3035_v51  ;;  %v2941_v56 = vadd.f32 0.2548296, %v2925_v34  ;;  %v2878_v24 = vadd.f32 1.4214138, %v2862_v39 }
 0x2b8   : > { %v3034_v40 = vmul.f32 %v4542_v15, %v2954_v32  ;;  %v2908_v28 = vadd.f32 -0.28449672, %v2892_v7  ;;  %v2895_v63 = vmul.f32 %v5732_v47, %v2879_v22  ;;  %v2714_v25 = vmul.f32 0.5, %v5635_v60 }
 0x2b9   : > { %v3128_v52 = vmul.f32 %v3112_v23, %v2712_v17  ;;  %v3083_v0 = vsub.f32 0.0, %v3051_v46  ;;  %v2957_v13 = vmul.f32 %v5715_v26, %v2941_v56  ;;  %v2894_v26 = vmul.f32 %v5736_v5, %v2878_v24  ;;  %v4548_v11 = vpop.eup %4547 }
 0x2ba   : > { %v3050_v18 = vsub.f32 1.0, %v3034_v40  ;;  %v2924_v17 = vmul.f32 %v5725_v42, %v2908_v28  ;;  %v2911_v19 = vadd.f32 -0.28449672, %v2895_v63  ;;  %v2715_v45 = vmul.f32 0.5, %v5627_v6 }
 0x2bb   : > { %v3037_v30 = vmul.f32 %v4544_v2, %v2957_v13  ;;  %4304 = vmatprep.mubr.msk.f32.mxu1 %vm426_vm1, %v3128_v52  ;;  %v3099_v61 = vsel %vm3067_vm14, %v3083_v0, %v3051_v46  ;;  %v2910_v36 = vadd.f32 -0.28449672, %v2894_v26  ;;  %vm3069_vm0 = vcmp.lt.f32.partialorder %v5663_v14, 0.0 }
 0x2bc   : > { %4305 = vmatmul.mubr.msk.f32.gmra.mrb[40].mxu1 %vm426_vm1, %v3129_v3  ;;  %v3082_v58 = vsub.f32 0.0, %v3050_v18  ;;  %v2940_v54 = vadd.f32 0.2548296, %v2924_v17  ;;  %v3115_v37 = vadd.f32 1.0, %v3099_v61  ;;  %v2927_v10 = vmul.f32 %v5732_v47, %v2911_v19  ;;  %v4551_v17 = vld [vmem:[%s4721_s25 + $0x28] sm:$0x3] }
 0x2bd   : > { %v3053_v33 = vsub.f32 1.0, %v3037_v30  ;;  %v2926_v4 = vmul.f32 %v5736_v5, %v2910_v36  ;;  %vm3068_vm2 = vcmp.lt.f32.partialorder %v5687_v38, 0.0  ;;  %v2716_v14 = vmul.f32 0.5, %v5671_v1  ;;  %v4553_v36 = vld [vmem:[%s4721_s25 + $0x20] sm:$0xff] }
 0x2be   : > { %v3098_v43 = vsel %vm3066_vm15, %v3082_v58, %v3050_v18  ;;  %v2956_v9 = vmul.f32 %v5725_v42, %v2940_v54  ;;  %v2943_v20 = vadd.f32 0.2548296, %v2927_v10  ;;  %v3131_v41 = vmul.f32 %v3115_v37, %v2715_v45  ;;  %v4550_v42 = vpop.eup %4549 }
 0x2bf   : > { %v3114_v35 = vadd.f32 1.0, %v3098_v43  ;;  %v3085_v49 = vsub.f32 0.0, %v3053_v33  ;;  %v2942_v51 = vadd.f32 0.2548296, %v2926_v4  ;;  %v2717_v32 = vmul.f32 0.5, %v5645_v50  ;;  %v4555_v4 = vld [vmem:[%s4721_s25 + $0x30] sm:$0xff] }
 0x2c0   : > { %v3036_v31 = vmul.f32 %v4546_v8, %v2956_v9  ;;  %v2959_v57 = vmul.f32 %v5732_v47, %v2943_v20  ;;  %vm3071_vm3 = vcmp.lt.f32.partialorder %v5692_v44, 0.0  ;;  %vm3070_vm4 = vcmp.lt.f32.partialorder %v5696_v27, 0.0 }
 0x2c1   : > { %v3130_v59 = vmul.f32 %v3114_v35, %v2714_v25  ;;  %v3101_v34 = vsel %vm3069_vm0, %v3085_v49, %v3053_v33  ;;  %v2958_v55 = vmul.f32 %v5736_v5, %v2942_v51  ;;  %v2718_v1 = vmul.f32 0.5, %v5681_v29  ;;  %v5785_v29 = vld [vmem:[%s5930_s6] ss:$0 sm:$0xff]  ;;  %v4552_v33 = vld [vmem:[%s4721_s25 + $0x18] sm:$0xff] }
 0x2c2   : > { %v3052_v60 = vsub.f32 1.0, %v3036_v31  ;;  %v3039_v16 = vmul.f32 %v4548_v11, %v2959_v57  ;;  %v3117_v12 = vadd.f32 1.0, %v3101_v34  ;;  %v2719_v50 = vmul.f32 0.5, %v5675_v53  ;;  %v5790_v53 = vld [vmem:[%s5931_s7] ss:$0 sm:$0xff]  ;;  %v4556_v11 = vld [vmem:[%s4721_s25 + $0x38] sm:$0xff] }
 0x2c3   : > { %4307 = vmatprep.mubr.msk.f32.mxu1 %vm426_vm1, %v3130_v59  ;;  %v3038_v48 = vmul.f32 %v4550_v42, %v2958_v55  ;;  %vm3379_vm5 = vcmask 1040384   ;;  %vm3455_vm6 = vcmask 24576   ;;  %vm3452_vm7 = vcmask 31745   ;;  %v4554_v35 = vld [vmem:[%s4721_s25 + $0x40] sm:$0x3] }
 0x2c4   : > { %4308 = vmatmul.mubr.msk.f32.gmra.mrb[42].mxu1 %vm426_vm1, %v3131_v41  ;;  %v3084_v6 = vsub.f32 0.0, %v3052_v60  ;;  %v3055_v23 = vsub.f32 1.0, %v3039_v16  ;;  %v3133_v7 = vmul.f32 %v3117_v12, %v2717_v32  ;;  %v4557_v34 = vld [vmem:[%s4721_s25 + $0x58] sm:$0x3]  ;;  %v4558_v16 = vld [vmem:[%s4721_s25 + $0x48] sm:$0xff] }
 0x2c5   : > { %v3054_v47 = vsub.f32 1.0, %v3038_v48 }
 0x2c6   : > { %v3100_v62 = vsel %vm3068_vm2, %v3084_v6, %v3052_v60  ;;  %v3087_v56 = vsub.f32 0.0, %v3055_v23 }
 0x2c7   : > { %v3116_v46 = vadd.f32 1.0, %v3100_v62  ;;  %v3086_v5 = vsub.f32 0.0, %v3054_v47  ;;  %v4559_v62 = vld [vmem:[%s4721_s25 + $0x50] sm:$0xff] }
 0x2c8   : > { %v3103_v21 = vsel %vm3071_vm3, %v3087_v56, %v3055_v23 }
 0x2c9   : > { %v3132_v15 = vmul.f32 %v3116_v46, %v2716_v14  ;;  %v3119_v38 = vadd.f32 1.0, %v3103_v21  ;;  %v3102_v39 = vsel %vm3070_vm4, %v3086_v5, %v3054_v47 }
 0x2ca   : > { %v3118_v52 = vadd.f32 1.0, %v3102_v39  ;;  %v4561_v39 = vld [vmem:[%s4721_s25 + $0x60] sm:$0xff] }
 0x2cb   : > { %4310 = vmatprep.mubr.msk.f32.mxu1 %vm426_vm1, %v3132_v15  ;;  %v3135_v44 = vmul.f32 %v3119_v38, %v2719_v50 }
 0x2cc   : > { %4311 = vmatmul.mubr.msk.f32.gmra.mrb[44].mxu1 %vm426_vm1, %v3133_v7  ;;  %v3134_v0 = vmul.f32 %v3118_v52, %v2718_v1  ;;  %v4560_v7 = vld [vmem:[%s4721_s25 + $0x70] sm:$0x3]  ;;  %v4562_v52 = vld [vmem:[%s4721_s25 + $0x68] sm:$0xff] }
 0x2ce   : > { %4313 = vmatprep.mubr.msk.f32.mxu1 %vm426_vm1, %v3134_v0 }
 0x2d0   : > { %4314 = vmatmul.mubr.msk.f32.gmra.mrb[46].mxu1 %vm426_vm1, %v3135_v44 }
 0x35e   : > { %v4294_v27 = vpop.f32.mrb[32].mxu1 }
 0x35f   : > { %v3267_v40 = vadd.f32 %v4294_v27, %v5785_v29  ;;  %v3261_v13 = vpop.f32.mrb[33].mxu1 }
 0x360   : > { %v3262_v2 = vadd.f32 %v5785_v29, %v3261_v13 }
 0x361   : > { %v3348_v3 = vmul.f32 %v5790_v53, %v3267_v40 }
 0x362   : > { %v3347_v28 = vmul.f32 %v5790_v53, %v3262_v2  ;;  %v4297_v22 = vpop.f32.mrb[34].mxu1 }
 0x363   : > { %v3381_v24 = vrot.slane %v3348_v3, 7  ;;  %v3277_v8 = vadd.f32 %v4297_v22, %v5785_v29  ;;  %v3271_v18 = vpop.f32.mrb[35].mxu1  ;;  %v4563_v22 = vld [vmem:[%s4721_s25 + $0x88] sm:$0x3] }
 0x364   : > { %v3380_v30 = vrot.slane %v3347_v28, 7  ;;  %v3272_v61 = vadd.f32 %v5785_v29, %v3271_v18  ;;  %v4564_v18 = vld [vmem:[%s4721_s25 + $0x78] sm:$0xff] }
 0x365   : > { %v3430_v63 = vadd.f32 %v4551_v17, %v3381_v24  ;;  %v3350_v26 = vmul.f32 %v5790_v53, %v3277_v8 }
 0x366   : > { %v3382_v58 = vsel %vm3379_vm5, %v3380_v30, %v3381_v24  ;;  %v3428_v54 = vadd.f32 %v4552_v33, %v3380_v30  ;;  %v3349_v19 = vmul.f32 %v5790_v53, %v3272_v61  ;;  %v4565_v61 = vld [vmem:[%s4721_s25 + $0x80] sm:$0xff] }
 0x367   : > { %3456 = vst.msk [vmem:[%s5800_s24 + $0xf] sm:$0x1] %vm3455_vm6, %v3430_v63  ;;  %v3429_v37 = vadd.f32 %v4553_v36, %v3382_v58  ;;  %v3384_v25 = vrot.slane %v3350_v26, 7 }
 0x368   : > { %3453 = vst.msk [vmem:[%s5800_s24 - $0x1] sm:$0xfe] %vm3452_vm7, %v3428_v54  ;;  %v3383_v43 = vrot.slane %v3349_v19, 7  ;;  %v4300_v49 = vpop.f32.mrb[36].mxu1 }
 0x369   : > { %3454 = vst.msk [vmem:[%s5800_s24 + $0x7] sm:$0xff] %vm426_vm1, %v3429_v37  ;;  %v3433_v9 = vadd.f32 %v4554_v35, %v3384_v25  ;;  %v3287_v31 = vadd.f32 %v4300_v49, %v5785_v29  ;;  %v3281_v20 = vpop.f32.mrb[37].mxu1 }
 0x36a   : > { %v3385_v10 = vsel %vm3379_vm5, %v3383_v43, %v3384_v25  ;;  %v3431_v45 = vadd.f32 %v4555_v4, %v3383_v43  ;;  %v3282_v41 = vadd.f32 %v5785_v29, %v3281_v20  ;;  %v4566_v25 = vld [vmem:[%s4721_s25 + $0xa0] sm:$0x3]  ;;  %v4568_v4 = vld [vmem:[%s4721_s25 + $0x98] sm:$0xff] }
 0x36b   : > { %3459 = vst.msk [vmem:[%s5800_s24 + $0x1f] sm:$0x1] %vm3455_vm6, %v3433_v9  ;;  %v3432_v59 = vadd.f32 %v4556_v11, %v3385_v10  ;;  %v3352_v51 = vmul.f32 %v5790_v53, %v3287_v31  ;;  %v4567_v9 = vld [vmem:[%s4721_s25 + $0x90] sm:$0xff] }
 0x36c   : > { %3457 = vst.msk [vmem:[%s5800_s24 + $0xf] sm:$0xfe] %vm3452_vm7, %v3431_v45  ;;  %v3351_v60 = vmul.f32 %v5790_v53, %v3282_v41 }
 0x36d   : > { %3458 = vst.msk [vmem:[%s5800_s24 + $0x17] sm:$0xff] %vm426_vm1, %v3432_v59  ;;  %v3387_v57 = vrot.slane %v3352_v51, 7 }
 0x36e   : > { %v3386_v42 = vrot.slane %v3351_v60, 7 }
 0x36f   : > { %v3436_v55 = vadd.f32 %v4557_v34, %v3387_v57 }
 0x370   : > { %v3388_v6 = vsel %vm3379_vm5, %v3386_v42, %v3387_v57  ;;  %v3434_v48 = vadd.f32 %v4558_v16, %v3386_v42  ;;  %v4303_v12 = vpop.f32.mrb[38].mxu1 }
 0x371   : > { %3462 = vst.msk [vmem:[%s5800_s24 + $0x2f] sm:$0x1] %vm3455_vm6, %v3436_v55  ;;  %v3435_v23 = vadd.f32 %v4559_v62, %v3388_v6  ;;  %v3297_v14 = vadd.f32 %v4303_v12, %v5785_v29  ;;  %v3291_v46 = vpop.f32.mrb[39].mxu1  ;;  %v4569_v55 = vld [vmem:[%s4721_s25 + $0xb8] sm:$0x3]  ;;  %v4570_v12 = vld [vmem:[%s4721_s25 + $0xa8] sm:$0xff] }
 0x372   : > { %3460 = vst.msk [vmem:[%s5800_s24 + $0x1f] sm:$0xfe] %vm3452_vm7, %v3434_v48  ;;  %v3292_v47 = vadd.f32 %v5785_v29, %v3291_v46 }
 0x373   : > { %3461 = vst.msk [vmem:[%s5800_s24 + $0x27] sm:$0xff] %vm426_vm1, %v3435_v23  ;;  %v3354_v32 = vmul.f32 %v5790_v53, %v3297_v14  ;;  %v4571_v14 = vld [vmem:[%s4721_s25 + $0xb0] sm:$0xff] }
 0x374   : > { %v3353_v56 = vmul.f32 %v5790_v53, %v3292_v47 }
 0x375   : > { %v3390_v15 = vrot.slane %v3354_v32, 7 }
 0x376   : > { %v3389_v5 = vrot.slane %v3353_v56, 7  ;;  %v4572_v56 = vld [vmem:[%s4721_s25 + $0xd0] sm:$0x3] }
 0x377   : > { %v3439_v21 = vadd.f32 %v4560_v7, %v3390_v15  ;;  %v4573_v7 = vld [vmem:[%s4721_s25 + $0xc0] sm:$0xff] }
 0x378   : > { %v3391_v38 = vsel %vm3379_vm5, %v3389_v5, %v3390_v15  ;;  %v3437_v1 = vadd.f32 %v4561_v39, %v3389_v5 }
 0x379   : > { %3465 = vst.msk [vmem:[%s5800_s24 + $0x3f] sm:$0x1] %vm3455_vm6, %v3439_v21  ;;  %v3438_v50 = vadd.f32 %v4562_v52, %v3391_v38  ;;  %v4574_v38 = vld [vmem:[%s4721_s25 + $0xc8] sm:$0xff] }
 0x37a   : > { %3463 = vst.msk [vmem:[%s5800_s24 + $0x2f] sm:$0xfe] %vm3452_vm7, %v3437_v1 }
 0x37b   : > { %3464 = vst.msk [vmem:[%s5800_s24 + $0x37] sm:$0xff] %vm426_vm1, %v3438_v50 }
 0x38f   : > { %v4306_v0 = vpop.f32.mrb[40].mxu1 }
 0x390   : > { %v3307_v44 = vadd.f32 %v4306_v0, %v5785_v29  ;;  %v3301_v27 = vpop.f32.mrb[41].mxu1 }
 0x391   : > { %v3302_v40 = vadd.f32 %v5785_v29, %v3301_v27 }
 0x392   : > { %v3356_v13 = vmul.f32 %v5790_v53, %v3307_v44 }
 0x393   : > { %v3355_v2 = vmul.f32 %v5790_v53, %v3302_v40 }
 0x394   : > { %v3393_v3 = vrot.slane %v3356_v13, 7 }
 0x395   : > { %v3392_v28 = vrot.slane %v3355_v2, 7 }
 0x396   : > { %v3442_v24 = vadd.f32 %v4563_v22, %v3393_v3 }
 0x397   : > { %v3394_v8 = vsel %vm3379_vm5, %v3392_v28, %v3393_v3  ;;  %v3440_v30 = vadd.f32 %v4564_v18, %v3392_v28  ;;  %v4309_v63 = vpop.f32.mrb[42].mxu1 }
 0x398   : > { %3468 = vst.msk [vmem:[%s5800_s24 + $0x4f] sm:$0x1] %vm3455_vm6, %v3442_v24  ;;  %v3441_v17 = vadd.f32 %v4565_v61, %v3394_v8  ;;  %v3317_v26 = vadd.f32 %v4309_v63, %v5785_v29  ;;  %v3311_v58 = vpop.f32.mrb[43].mxu1 }
 0x399   : > { %3466 = vst.msk [vmem:[%s5800_s24 + $0x3f] sm:$0xfe] %vm3452_vm7, %v3440_v30  ;;  %v3312_v33 = vadd.f32 %v5785_v29, %v3311_v58 }
 0x39a   : > { %3467 = vst.msk [vmem:[%s5800_s24 + $0x47] sm:$0xff] %vm426_vm1, %v3441_v17  ;;  %v3358_v54 = vmul.f32 %v5790_v53, %v3317_v26 }
 0x39b   : > { %v3357_v19 = vmul.f32 %v5790_v53, %v3312_v33 }
 0x39c   : > { %v3396_v36 = vrot.slane %v3358_v54, 7 }
 0x39d   : > { %v3395_v37 = vrot.slane %v3357_v19, 7 }
 0x39e   : > { %v3445_v43 = vadd.f32 %v4566_v25, %v3396_v36 }
 0x39f   : > { %v3397_v35 = vsel %vm3379_vm5, %v3395_v37, %v3396_v36  ;;  %v3443_v10 = vadd.f32 %v4567_v9, %v3395_v37  ;;  %v4312_v49 = vpop.f32.mrb[44].mxu1 }
 0x3a0   : > { %3471 = vst.msk [vmem:[%s5800_s24 + $0x5f] sm:$0x1] %vm3455_vm6, %v3445_v43  ;;  %v3444_v45 = vadd.f32 %v4568_v4, %v3397_v35  ;;  %v3327_v11 = vadd.f32 %v4312_v49, %v5785_v29  ;;  %v3321_v59 = vpop.f32.mrb[45].mxu1 }
 0x3a1   : > { %3469 = vst.msk [vmem:[%s5800_s24 + $0x4f] sm:$0xfe] %vm3452_vm7, %v3443_v10  ;;  %v3322_v31 = vadd.f32 %v5785_v29, %v3321_v59 }
 0x3a2   : > { %3470 = vst.msk [vmem:[%s5800_s24 + $0x57] sm:$0xff] %vm426_vm1, %v3444_v45  ;;  %v3360_v20 = vmul.f32 %v5790_v53, %v3327_v11 }
 0x3a3   : > { %v3359_v41 = vmul.f32 %v5790_v53, %v3322_v31  ;;  %v4315_v60 = vpop.f32.mrb[46].mxu1 }
 0x3a4   : > { %v3399_v51 = vrot.slane %v3360_v20, 7  ;;  %v3337_v42 = vadd.f32 %v4315_v60, %v5785_v29  ;;  %v3331_v34 = vpop.f32.mrb[47].mxu1 }
 0x3a5   : > { %v3398_v57 = vrot.slane %v3359_v41, 7  ;;  %v3332_v16 = vadd.f32 %v5785_v29, %v3331_v34 }
 0x3a6   : > { %v3448_v6 = vadd.f32 %v4569_v55, %v3399_v51  ;;  %v3362_v23 = vmul.f32 %v5790_v53, %v3337_v42 }
 0x3a7   : > { %v3400_v48 = vsel %vm3379_vm5, %v3398_v57, %v3399_v51  ;;  %v3446_v62 = vadd.f32 %v4570_v12, %v3398_v57  ;;  %v3361_v47 = vmul.f32 %v5790_v53, %v3332_v16 }
 0x3a8   : > { %3474 = vst.msk [vmem:[%s5800_s24 + $0x6f] sm:$0x1] %vm3455_vm6, %v3448_v6  ;;  %v3447_v46 = vadd.f32 %v4571_v14, %v3400_v48  ;;  %v3402_v29 = vrot.slane %v3362_v23, 7 }
 0x3a9   : > { %3472 = vst.msk [vmem:[%s5800_s24 + $0x5f] sm:$0xfe] %vm3452_vm7, %v3446_v62  ;;  %v3401_v32 = vrot.slane %v3361_v47, 7 }
 0x3aa   : > { %3473 = vst.msk [vmem:[%s5800_s24 + $0x67] sm:$0xff] %vm426_vm1, %v3447_v46  ;;  %v3451_v15 = vadd.f32 %v4572_v56, %v3402_v29 }
 0x3ab   : > { %v3403_v5 = vsel %vm3379_vm5, %v3401_v32, %v3402_v29  ;;  %v3449_v21 = vadd.f32 %v4573_v7, %v3401_v32 }
 0x3ac   : > { %3477 = vst.msk [vmem:[%s5800_s24 + $0x7f] sm:$0x1] %vm3455_vm6, %v3451_v15  ;;  %v3450_v39 = vadd.f32 %v4574_v38, %v3403_v5 }
 0x3ad   : > { %3475 = vst.msk [vmem:[%s5800_s24 + $0x6f] sm:$0xfe] %vm3452_vm7, %v3449_v21 }
 0x3ae   : > { %3476 = vst.msk [vmem:[%s5800_s24 + $0x77] sm:$0xff] %vm426_vm1, %v3450_v39 }
 0x3af PF: > { %s18_s9 = sadd.s32 1, %s4613_s9   ;;  %s6001_s27 = smov %s4605_s29 }
 0x3b0   : > { %p15_p7 = scmp.ge.s32.totalorder %s18_s9, 6   ;;  %s6002_s28 = smov %s4609_s30 }
 0x3b1   : > { %s6003_s29 = smov %s6006_s10  ;;  %s6004_s30 = smov %s6010_s11 }
 0x3b2   :  { %17 = sbr.rel (!%p15_p7) target bundleno = 3 (0x3), region = 93 }

</bundles_post_ra>
